<compile_context>
chip_gen: v5e
topology: v5e:2x2
jax: 0.10.0
libtpu: 0.0.40
codegen_flags: <defaults>
</compile_context>

<pallas_src>
import math
import functools

import jax
import jax.numpy as jnp
from jax.experimental import pallas as pl
from jax.experimental.pallas import tpu as pltpu

# ---- module constants (mirroring the PyTorch script) ----
SELECTED_FEATURES = ['hour', 'minute', 'LBGI', 'HBGI', 'Risk', 'CGM', 'CHO', 'insulin']
FEAT = len(SELECTED_FEATURES)          # 8
INPUT_SIZE = FEAT
HIDDEN_SIZE = FEAT
NUM_CLASSES = FEAT
STEP_LOOK_BACK = 10
DROPOUT_RATE = 0.8                     # adolescent
DROPOUT_TYPE = 2                       # adolescent


def pack_lstm_params(w_ih, w_hh, b_ih, b_hh, w_lin, b_lin):
    """One-time (init-time) packing of all fixed parameters into ONE f32 slab.

    Row layout of the returned (I + 2H + 2, 4H) array:
      [0 : I)        w_ih.T   (g-gate columns pre-scaled by 2)
      [I : I+H)      w_hh.T   (g-gate columns pre-scaled by 2)
      [I+H : I+2H)   w_lin.T  (stored in columns [0:C))
      [I+2H]         b_lin    (stored in columns [0:C))
      [I+2H+1]       b_ih + b_hh (g-gate entries pre-scaled by 2)

    The x2 scaling on the g-gate lets the kernel recover tanh(z) from the
    full-slab sigmoid via tanh(z) = 2*sigmoid(2z) - 1, removing one dependent
    transcendental per recurrent step.  Scaling by exactly 2 is bit-exact in
    f32, so this does not change the numerics of the gate pre-activations.
    """
    H4, I = w_ih.shape
    H = H4 // 4
    C = w_lin.shape[0]
    s = jnp.ones((H4, 1), jnp.float32).at[2 * H:3 * H, :].set(2.0)
    wT_ih = (w_ih * s).T.astype(jnp.float32)                        # (I, 4H)
    wT_hh = (w_hh * s).T.astype(jnp.float32)                        # (H, 4H)
    bias = ((b_ih + b_hh) * s[:, 0])[None, :].astype(jnp.float32)   # (1, 4H)
    w_lin_T = jnp.zeros((H, H4), jnp.float32).at[:, :C].set(w_lin.T)
    b_lin_row = jnp.zeros((1, H4), jnp.float32).at[0, :C].set(b_lin)
    return jnp.concatenate([wT_ih, wT_hh, w_lin_T, b_lin_row, bias], axis=0)


def _lstm_kernel(x_tf_ref, maskT_ref, params_ref, out_ref, *,
                 step_look_back: int, seq_len: int, batch: int,
                 input_size: int, hidden_size: int, num_classes: int):
    """Full recurrent loop (T small, fully unrolled) inside one kernel.

    x_tf_ref  : (step_look_back*B, I)  time-major flattened teacher-forcing inputs
    maskT_ref : (I, 4H)                transposed dropout mask (mask_hh == mask_ih)
    params_ref: (I+2H+2, 4H)           packed fixed parameters (see pack_lstm_params)
    out_ref   : (P, B, C)              P = seq_len - step_look_back
    """
    B, T, I, H, C = batch, seq_len, input_size, hidden_size, num_classes
    P = T - step_look_back

    maskT = maskT_ref[...]                                   # (I, 4H)
    params = params_ref[...]                                 # (I+2H+2, 4H)

    # ---- one-time prologue: masking, head fusion, batched TF projection ----
    wT_ih = params[0:I, :] * maskT                           # (I, 4H)
    wT_hh = params[I:I + H, :] * maskT                       # (H, 4H)
    lin = params[I + H:I + 2 * H + 1, 0:C]                   # (H+1, C): [w_lin.T ; b_lin]
    bias = params[I + 2 * H + 1:I + 2 * H + 2, :]            # (1, 4H)
    w_lin_T = lin[0:H, :]                                    # (H, C)
    b_lin = lin[H:H + 1, :]                                  # (1, C)

    # Fold the Linear head into the autoregressive recurrence:
    #   x_t = h_{t-1} @ w_lin_T + b_lin
    #   gates = h_{t-1} @ (wT_hh + w_lin_T @ wT_ih) + (b_lin @ wT_ih + bias)
    # (one stacked (H+1,C)@(C,4H) matmul computes both fused terms)
    lin_proj = jnp.dot(lin, wT_ih, preferred_element_type=jnp.float32)   # (H+1, 4H)
    w_fused = wT_hh + lin_proj[0:H, :]
    const = lin_proj[H:H + 1, :] + bias

    # All teacher-forcing input projections as ONE matmul (off the dependent chain).
    xg = jnp.dot(x_tf_ref[...], wT_ih,
                 preferred_element_type=jnp.float32) + bias              # (SLB*B, 4H)

    h = jnp.zeros((B, H), jnp.float32)
    c = jnp.zeros((B, H), jnp.float32)

    def gate_update(gates, c_prev):
        # One sigmoid push over the whole (B, 4H) slab; the g gate is recovered
        # as tanh(z_g) = 2*sigmoid(2*z_g) - 1 (its pre-activation was pre-scaled
        # by 2 at pack time), so no per-step tanh on the gate slab.
        sig = jax.nn.sigmoid(gates)
        g_g = 2.0 * sig[:, 2 * H:3 * H] - 1.0
        c_new = sig[:, H:2 * H] * c_prev + sig[:, 0:H] * g_g
        h_new = sig[:, 3 * H:4 * H] * jnp.tanh(c_new)
        return h_new, c_new

    # --- teacher-forcing phase: 1 dependent matmul per step (h-projection) ---
    for i in range(step_look_back):
        gates = xg[i * B:(i + 1) * B, :] + jnp.dot(
            h, wT_hh, preferred_element_type=jnp.float32)
        h, c = gate_update(gates, c)

    # --- autoregressive phase: head folded in -> 1 dependent matmul per step ---
    hs = []
    for _ in range(P):
        gates = jnp.dot(h, w_fused, preferred_element_type=jnp.float32) + const
        h, c = gate_update(gates, c)
        hs.append(h)

    # --- epilogue: ONE head matmul over all P emitted steps ---
    h_all = jnp.concatenate(hs, axis=0)                                  # (P*B, H)
    y_all = jnp.dot(h_all, w_lin_T,
                    preferred_element_type=jnp.float32) + b_lin          # (P*B, C)
    for p in range(P):
        out_ref[p] = y_all[p * B:(p + 1) * B, :]


@functools.partial(jax.jit, static_argnames=("step_look_back",))
def lstm_forward_pallas(x, maskT, params, *, step_look_back):
    """x: (B, T, I); maskT: (I, 4H) dropout mask (transposed); params: packed weights."""
    B, T, I = x.shape
    H = maskT.shape[1] // 4
    C = I
    # Head fusion + shared dropout mask (dropout_type 2) require I == H == C.
    assert I == H == C, (I, H, C)
    assert maskT.shape == (I, 4 * H), maskT.shape
    assert params.shape == (I + 2 * H + 2, 4 * H), params.shape
    P = T - step_look_back

    # Layout plumbing only (tiny, fused under jit): time-major TF block (SLB*B, I).
    x_tf = jnp.swapaxes(x[:, :step_look_back, :], 0, 1).reshape(
        step_look_back * B, I).astype(jnp.float32)

    vmem = pl.BlockSpec(memory_space=pltpu.MemorySpace.VMEM)
    kernel = functools.partial(
        _lstm_kernel, step_look_back=step_look_back, seq_len=T, batch=B,
        input_size=I, hidden_size=H, num_classes=C)

    out = pl.pallas_call(
        kernel,
        out_shape=jax.ShapeDtypeStruct((P, B, C), jnp.float32),
        in_specs=[vmem, vmem, vmem],
        out_specs=vmem,
    )(x_tf, maskT, params)

    return jnp.swapaxes(out, 0, 1)         # (B, P, C)


def lstm_forward_ref(x, w_ih, w_hh, b_ih, b_hh, mask_ih, mask_hh,
                     w_lin, b_lin, step_look_back):
    """Pure-JAX reference of the PyTorch forward, for verification."""
    B, T, _ = x.shape
    H = w_hh.shape[1]
    wi = w_ih * mask_ih
    wh = w_hh * mask_hh
    h = jnp.zeros((B, H), jnp.float32)
    c = jnp.zeros((B, H), jnp.float32)
    outs = []
    y = None
    for i in range(T):
        x_t = x[:, i, :] if i <= step_look_back - 1 else y
        gates = x_t @ wi.T + b_ih + h @ wh.T + b_hh
        i_g = jax.nn.sigmoid(gates[:, 0 * H:1 * H])
        f_g = jax.nn.sigmoid(gates[:, 1 * H:2 * H])
        g_g = jnp.tanh(gates[:, 2 * H:3 * H])
        o_g = jax.nn.sigmoid(gates[:, 3 * H:4 * H])
        c = f_g * c + i_g * g_g
        h = o_g * jnp.tanh(c)
        y = h @ w_lin.T + b_lin
        outs.append(y)
    return jnp.stack(outs[step_look_back:], axis=1)


if __name__ == "__main__":
    key = jax.random.PRNGKey(0)
    B, T = 2, 16                       # predict_length = T - STEP_LOOK_BACK = 6
    I, H, C = INPUT_SIZE, HIDDEN_SIZE, NUM_CLASSES

    keys = jax.random.split(key, 8)
    # PyTorch LSTMCell / Linear init: U(-1/sqrt(H), 1/sqrt(H))
    bound = 1.0 / math.sqrt(H)
    w_ih = jax.random.uniform(keys[0], (4 * H, I), jnp.float32, -bound, bound)
    w_hh = jax.random.uniform(keys[1], (4 * H, H), jnp.float32, -bound, bound)
    b_ih = jax.random.uniform(keys[2], (4 * H,), jnp.float32, -bound, bound)
    b_hh = jax.random.uniform(keys[3], (4 * H,), jnp.float32, -bound, bound)
    w_lin = jax.random.uniform(keys[4], (C, H), jnp.float32, -bound, bound)
    b_lin = jax.random.uniform(keys[5], (C,), jnp.float32, -bound, bound)

    # One-time weight packing (init-time, not on the per-forward path).
    params = pack_lstm_params(w_ih, w_hh, b_ih, b_hh, w_lin, b_lin)

    # dropout_type == 2: one bernoulli mask on (4H, I), "expanded" to (4H, H)
    # (a no-op here since input_size == hidden_size), scaled by 1/dropout_rate.
    # TODO(synk): the PyTorch module draws this mask inside forward(); here it is
    # drawn host-side with jax.random so the kernel and the reference share the
    # exact same realization (in-kernel pltpu PRNG would not be verifiable).
    bern = jax.random.bernoulli(keys[6], DROPOUT_RATE, (4 * H, I)).astype(jnp.float32)
    mask_ih = bern / DROPOUT_RATE
    mask_hh = mask_ih                  # expand(-1, hidden_size) with I == H
    maskT = mask_ih.T                  # (I, 4H), the layout the kernel consumes

    x = jax.random.normal(keys[7], (B, T, I), jnp.float32)

    out = lstm_forward_pallas(x, maskT, params, step_look_back=STEP_LOOK_BACK)
    out = jax.block_until_ready(out)

    ref = lstm_forward_ref(x, w_ih, w_hh, b_ih, b_hh, mask_ih, mask_hh,
                           w_lin, b_lin, STEP_LOOK_BACK)
    assert out.shape == (B, T - STEP_LOOK_BACK, C), out.shape
    # Head-fusion reassociates f32 sums and g is computed via the sigmoid
    # identity; keep a tolerance that still catches any real bug (wrong gate
    # order / mask / fusion errors are O(1), not O(1e-4)).
    assert jnp.allclose(out, ref, atol=2e-4, rtol=2e-4), "mismatch vs reference"

    print("KERNEL_OK")
</pallas_src>

<mosaic_0001>
module attributes {stable_mosaic.version = 11 : i64} {
  func.func @_lstm_kernel(%arg0: memref<20x8xf32, #tpu.memory_space<vmem>>, %arg1: memref<8x32xf32, #tpu.memory_space<vmem>>, %arg2: memref<26x32xf32, #tpu.memory_space<vmem>>, %arg3: memref<6x2x8xf32, #tpu.memory_space<vmem>>) attributes {dimension_semantics = [], scalar_prefetch = 0 : i64, scratch_operands = 0 : i64, tpu.core_type = #tpu.core_type<tc>} {
    %c0 = arith.constant 0 : index
    %c0_0 = arith.constant 0 : index
    %0 = vector.load %arg1[%c0, %c0_0] : memref<8x32xf32, #tpu.memory_space<vmem>>, vector<8x32xf32>
    %c0_1 = arith.constant 0 : index
    %c0_2 = arith.constant 0 : index
    %1 = vector.load %arg2[%c0_1, %c0_2] : memref<26x32xf32, #tpu.memory_space<vmem>>, vector<26x32xf32>
    %2 = vector.extract_strided_slice %1 {offsets = [0, 0], sizes = [8, 32], strides = [1, 1]} : vector<26x32xf32> to vector<8x32xf32>
    %3 = arith.mulf %2, %0 : vector<8x32xf32>
    %4 = vector.extract_strided_slice %1 {offsets = [8, 0], sizes = [8, 32], strides = [1, 1]} : vector<26x32xf32> to vector<8x32xf32>
    %5 = arith.mulf %4, %0 : vector<8x32xf32>
    %6 = vector.extract_strided_slice %1 {offsets = [16, 0], sizes = [9, 8], strides = [1, 1]} : vector<26x32xf32> to vector<9x8xf32>
    %7 = vector.extract_strided_slice %1 {offsets = [25, 0], sizes = [1, 32], strides = [1, 1]} : vector<26x32xf32> to vector<1x32xf32>
    %8 = vector.extract_strided_slice %6 {offsets = [0, 0], sizes = [8, 8], strides = [1, 1]} : vector<9x8xf32> to vector<8x8xf32>
    %9 = vector.extract_strided_slice %6 {offsets = [8, 0], sizes = [1, 8], strides = [1, 1]} : vector<9x8xf32> to vector<1x8xf32>
    %cst = arith.constant dense<0.000000e+00> : vector<9x32xf32>
    %10 = tpu.matmul %6, %3, %cst {dimension_numbers = #tpu.dot_dimension_numbers<[1], [0], [0], [1], [0, 0, 1, 1], [], []>} : vector<9x8xf32>, vector<8x32xf32>, vector<9x32xf32> -> vector<9x32xf32>
    %11 = vector.extract_strided_slice %10 {offsets = [0, 0], sizes = [8, 32], strides = [1, 1]} : vector<9x32xf32> to vector<8x32xf32>
    %12 = arith.addf %5, %11 : vector<8x32xf32>
    %13 = vector.extract_strided_slice %10 {offsets = [8, 0], sizes = [1, 32], strides = [1, 1]} : vector<9x32xf32> to vector<1x32xf32>
    %14 = arith.addf %13, %7 : vector<1x32xf32>
    %c0_3 = arith.constant 0 : index
    %c0_4 = arith.constant 0 : index
    %15 = vector.load %arg0[%c0_3, %c0_4] : memref<20x8xf32, #tpu.memory_space<vmem>>, vector<20x8xf32>
    %cst_5 = arith.constant dense<0.000000e+00> : vector<20x32xf32>
    %16 = tpu.matmul %15, %3, %cst_5 {dimension_numbers = #tpu.dot_dimension_numbers<[1], [0], [0], [1], [0, 0, 1, 1], [], []>} : vector<20x8xf32>, vector<8x32xf32>, vector<20x32xf32> -> vector<20x32xf32>
    %17 = vector.broadcast %7 : vector<1x32xf32> to vector<20x32xf32>
    %18 = arith.addf %16, %17 : vector<20x32xf32>
    %cst_6 = arith.constant 0.000000e+00 : f32
    %19 = vector.broadcast %cst_6 : f32 to vector<2x8xf32>
    %cst_7 = arith.constant 0.000000e+00 : f32
    %20 = vector.broadcast %cst_7 : f32 to vector<2x8xf32>
    %21 = vector.extract_strided_slice %18 {offsets = [0, 0], sizes = [2, 32], strides = [1, 1]} : vector<20x32xf32> to vector<2x32xf32>
    %cst_8 = arith.constant dense<0.000000e+00> : vector<2x32xf32>
    %22 = tpu.matmul %19, %5, %cst_8 {dimension_numbers = #tpu.dot_dimension_numbers<[1], [0], [0], [1], [0, 0, 1, 1], [], []>} : vector<2x8xf32>, vector<8x32xf32>, vector<2x32xf32> -> vector<2x32xf32>
    %23 = arith.addf %21, %22 : vector<2x32xf32>
    %24 = arith.negf %23 : vector<2x32xf32>
    %25 = math.exp %24 : vector<2x32xf32>
    %cst_9 = arith.constant 1.000000e+00 : f32
    %26 = vector.broadcast %cst_9 : f32 to vector<2x32xf32>
    %27 = arith.addf %26, %25 : vector<2x32xf32>
    %28 = arith.divf %26, %27 : vector<2x32xf32>
    %29 = vector.extract_strided_slice %28 {offsets = [0, 16], sizes = [2, 8], strides = [1, 1]} : vector<2x32xf32> to vector<2x8xf32>
    %cst_10 = arith.constant 2.000000e+00 : f32
    %30 = vector.broadcast %cst_10 : f32 to vector<2x8xf32>
    %31 = arith.mulf %30, %29 : vector<2x8xf32>
    %cst_11 = arith.constant 1.000000e+00 : f32
    %32 = vector.broadcast %cst_11 : f32 to vector<2x8xf32>
    %33 = arith.subf %31, %32 : vector<2x8xf32>
    %34 = vector.extract_strided_slice %28 {offsets = [0, 8], sizes = [2, 8], strides = [1, 1]} : vector<2x32xf32> to vector<2x8xf32>
    %35 = arith.mulf %34, %20 : vector<2x8xf32>
    %36 = vector.extract_strided_slice %28 {offsets = [0, 0], sizes = [2, 8], strides = [1, 1]} : vector<2x32xf32> to vector<2x8xf32>
    %37 = arith.mulf %36, %33 : vector<2x8xf32>
    %38 = arith.addf %35, %37 : vector<2x8xf32>
    %39 = vector.extract_strided_slice %28 {offsets = [0, 24], sizes = [2, 8], strides = [1, 1]} : vector<2x32xf32> to vector<2x8xf32>
    %40 = math.tanh %38 : vector<2x8xf32>
    %41 = arith.mulf %39, %40 : vector<2x8xf32>
    %42 = vector.extract_strided_slice %18 {offsets = [2, 0], sizes = [2, 32], strides = [1, 1]} : vector<20x32xf32> to vector<2x32xf32>
    %cst_12 = arith.constant dense<0.000000e+00> : vector<2x32xf32>
    %43 = tpu.matmul %41, %5, %cst_12 {dimension_numbers = #tpu.dot_dimension_numbers<[1], [0], [0], [1], [0, 0, 1, 1], [], []>} : vector<2x8xf32>, vector<8x32xf32>, vector<2x32xf32> -> vector<2x32xf32>
    %44 = arith.addf %42, %43 : vector<2x32xf32>
    %45 = arith.negf %44 : vector<2x32xf32>
    %46 = math.exp %45 : vector<2x32xf32>
    %cst_13 = arith.constant 1.000000e+00 : f32
    %47 = vector.broadcast %cst_13 : f32 to vector<2x32xf32>
    %48 = arith.addf %47, %46 : vector<2x32xf32>
    %49 = arith.divf %47, %48 : vector<2x32xf32>
    %50 = vector.extract_strided_slice %49 {offsets = [0, 16], sizes = [2, 8], strides = [1, 1]} : vector<2x32xf32> to vector<2x8xf32>
    %cst_14 = arith.constant 2.000000e+00 : f32
    %51 = vector.broadcast %cst_14 : f32 to vector<2x8xf32>
    %52 = arith.mulf %51, %50 : vector<2x8xf32>
    %cst_15 = arith.constant 1.000000e+00 : f32
    %53 = vector.broadcast %cst_15 : f32 to vector<2x8xf32>
    %54 = arith.subf %52, %53 : vector<2x8xf32>
    %55 = vector.extract_strided_slice %49 {offsets = [0, 8], sizes = [2, 8], strides = [1, 1]} : vector<2x32xf32> to vector<2x8xf32>
    %56 = arith.mulf %55, %38 : vector<2x8xf32>
    %57 = vector.extract_strided_slice %49 {offsets = [0, 0], sizes = [2, 8], strides = [1, 1]} : vector<2x32xf32> to vector<2x8xf32>
    %58 = arith.mulf %57, %54 : vector<2x8xf32>
    %59 = arith.addf %56, %58 : vector<2x8xf32>
    %60 = vector.extract_strided_slice %49 {offsets = [0, 24], sizes = [2, 8], strides = [1, 1]} : vector<2x32xf32> to vector<2x8xf32>
    %61 = math.tanh %59 : vector<2x8xf32>
    %62 = arith.mulf %60, %61 : vector<2x8xf32>
    %63 = vector.extract_strided_slice %18 {offsets = [4, 0], sizes = [2, 32], strides = [1, 1]} : vector<20x32xf32> to vector<2x32xf32>
    %cst_16 = arith.constant dense<0.000000e+00> : vector<2x32xf32>
    %64 = tpu.matmul %62, %5, %cst_16 {dimension_numbers = #tpu.dot_dimension_numbers<[1], [0], [0], [1], [0, 0, 1, 1], [], []>} : vector<2x8xf32>, vector<8x32xf32>, vector<2x32xf32> -> vector<2x32xf32>
    %65 = arith.addf %63, %64 : vector<2x32xf32>
    %66 = arith.negf %65 : vector<2x32xf32>
    %67 = math.exp %66 : vector<2x32xf32>
    %cst_17 = arith.constant 1.000000e+00 : f32
    %68 = vector.broadcast %cst_17 : f32 to vector<2x32xf32>
    %69 = arith.addf %68, %67 : vector<2x32xf32>
    %70 = arith.divf %68, %69 : vector<2x32xf32>
    %71 = vector.extract_strided_slice %70 {offsets = [0, 16], sizes = [2, 8], strides = [1, 1]} : vector<2x32xf32> to vector<2x8xf32>
    %cst_18 = arith.constant 2.000000e+00 : f32
    %72 = vector.broadcast %cst_18 : f32 to vector<2x8xf32>
    %73 = arith.mulf %72, %71 : vector<2x8xf32>
    %cst_19 = arith.constant 1.000000e+00 : f32
    %74 = vector.broadcast %cst_19 : f32 to vector<2x8xf32>
    %75 = arith.subf %73, %74 : vector<2x8xf32>
    %76 = vector.extract_strided_slice %70 {offsets = [0, 8], sizes = [2, 8], strides = [1, 1]} : vector<2x32xf32> to vector<2x8xf32>
    %77 = arith.mulf %76, %59 : vector<2x8xf32>
    %78 = vector.extract_strided_slice %70 {offsets = [0, 0], sizes = [2, 8], strides = [1, 1]} : vector<2x32xf32> to vector<2x8xf32>
    %79 = arith.mulf %78, %75 : vector<2x8xf32>
    %80 = arith.addf %77, %79 : vector<2x8xf32>
    %81 = vector.extract_strided_slice %70 {offsets = [0, 24], sizes = [2, 8], strides = [1, 1]} : vector<2x32xf32> to vector<2x8xf32>
    %82 = math.tanh %80 : vector<2x8xf32>
    %83 = arith.mulf %81, %82 : vector<2x8xf32>
    %84 = vector.extract_strided_slice %18 {offsets = [6, 0], sizes = [2, 32], strides = [1, 1]} : vector<20x32xf32> to vector<2x32xf32>
    %cst_20 = arith.constant dense<0.000000e+00> : vector<2x32xf32>
    %85 = tpu.matmul %83, %5, %cst_20 {dimension_numbers = #tpu.dot_dimension_numbers<[1], [0], [0], [1], [0, 0, 1, 1], [], []>} : vector<2x8xf32>, vector<8x32xf32>, vector<2x32xf32> -> vector<2x32xf32>
    %86 = arith.addf %84, %85 : vector<2x32xf32>
    %87 = arith.negf %86 : vector<2x32xf32>
    %88 = math.exp %87 : vector<2x32xf32>
    %cst_21 = arith.constant 1.000000e+00 : f32
    %89 = vector.broadcast %cst_21 : f32 to vector<2x32xf32>
    %90 = arith.addf %89, %88 : vector<2x32xf32>
    %91 = arith.divf %89, %90 : vector<2x32xf32>
    %92 = vector.extract_strided_slice %91 {offsets = [0, 16], sizes = [2, 8], strides = [1, 1]} : vector<2x32xf32> to vector<2x8xf32>
    %cst_22 = arith.constant 2.000000e+00 : f32
    %93 = vector.broadcast %cst_22 : f32 to vector<2x8xf32>
    %94 = arith.mulf %93, %92 : vector<2x8xf32>
    %cst_23 = arith.constant 1.000000e+00 : f32
    %95 = vector.broadcast %cst_23 : f32 to vector<2x8xf32>
    %96 = arith.subf %94, %95 : vector<2x8xf32>
    %97 = vector.extract_strided_slice %91 {offsets = [0, 8], sizes = [2, 8], strides = [1, 1]} : vector<2x32xf32> to vector<2x8xf32>
    %98 = arith.mulf %97, %80 : vector<2x8xf32>
    %99 = vector.extract_strided_slice %91 {offsets = [0, 0], sizes = [2, 8], strides = [1, 1]} : vector<2x32xf32> to vector<2x8xf32>
    %100 = arith.mulf %99, %96 : vector<2x8xf32>
    %101 = arith.addf %98, %100 : vector<2x8xf32>
    %102 = vector.extract_strided_slice %91 {offsets = [0, 24], sizes = [2, 8], strides = [1, 1]} : vector<2x32xf32> to vector<2x8xf32>
    %103 = math.tanh %101 : vector<2x8xf32>
    %104 = arith.mulf %102, %103 : vector<2x8xf32>
    %105 = vector.extract_strided_slice %18 {offsets = [8, 0], sizes = [2, 32], strides = [1, 1]} : vector<20x32xf32> to vector<2x32xf32>
    %cst_24 = arith.constant dense<0.000000e+00> : vector<2x32xf32>
    %106 = tpu.matmul %104, %5, %cst_24 {dimension_numbers = #tpu.dot_dimension_numbers<[1], [0], [0], [1], [0, 0, 1, 1], [], []>} : vector<2x8xf32>, vector<8x32xf32>, vector<2x32xf32> -> vector<2x32xf32>
    %107 = arith.addf %105, %106 : vector<2x32xf32>
    %108 = arith.negf %107 : vector<2x32xf32>
    %109 = math.exp %108 : vector<2x32xf32>
    %cst_25 = arith.constant 1.000000e+00 : f32
    %110 = vector.broadcast %cst_25 : f32 to vector<2x32xf32>
    %111 = arith.addf %110, %109 : vector<2x32xf32>
    %112 = arith.divf %110, %111 : vector<2x32xf32>
    %113 = vector.extract_strided_slice %112 {offsets = [0, 16], sizes = [2, 8], strides = [1, 1]} : vector<2x32xf32> to vector<2x8xf32>
    %cst_26 = arith.constant 2.000000e+00 : f32
    %114 = vector.broadcast %cst_26 : f32 to vector<2x8xf32>
    %115 = arith.mulf %114, %113 : vector<2x8xf32>
    %cst_27 = arith.constant 1.000000e+00 : f32
    %116 = vector.broadcast %cst_27 : f32 to vector<2x8xf32>
    %117 = arith.subf %115, %116 : vector<2x8xf32>
    %118 = vector.extract_strided_slice %112 {offsets = [0, 8], sizes = [2, 8], strides = [1, 1]} : vector<2x32xf32> to vector<2x8xf32>
    %119 = arith.mulf %118, %101 : vector<2x8xf32>
    %120 = vector.extract_strided_slice %112 {offsets = [0, 0], sizes = [2, 8], strides = [1, 1]} : vector<2x32xf32> to vector<2x8xf32>
    %121 = arith.mulf %120, %117 : vector<2x8xf32>
    %122 = arith.addf %119, %121 : vector<2x8xf32>
    %123 = vector.extract_strided_slice %112 {offsets = [0, 24], sizes = [2, 8], strides = [1, 1]} : vector<2x32xf32> to vector<2x8xf32>
    %124 = math.tanh %122 : vector<2x8xf32>
    %125 = arith.mulf %123, %124 : vector<2x8xf32>
    %126 = vector.extract_strided_slice %18 {offsets = [10, 0], sizes = [2, 32], strides = [1, 1]} : vector<20x32xf32> to vector<2x32xf32>
    %cst_28 = arith.constant dense<0.000000e+00> : vector<2x32xf32>
    %127 = tpu.matmul %125, %5, %cst_28 {dimension_numbers = #tpu.dot_dimension_numbers<[1], [0], [0], [1], [0, 0, 1, 1], [], []>} : vector<2x8xf32>, vector<8x32xf32>, vector<2x32xf32> -> vector<2x32xf32>
    %128 = arith.addf %126, %127 : vector<2x32xf32>
    %129 = arith.negf %128 : vector<2x32xf32>
    %130 = math.exp %129 : vector<2x32xf32>
    %cst_29 = arith.constant 1.000000e+00 : f32
    %131 = vector.broadcast %cst_29 : f32 to vector<2x32xf32>
    %132 = arith.addf %131, %130 : vector<2x32xf32>
    %133 = arith.divf %131, %132 : vector<2x32xf32>
    %134 = vector.extract_strided_slice %133 {offsets = [0, 16], sizes = [2, 8], strides = [1, 1]} : vector<2x32xf32> to vector<2x8xf32>
    %cst_30 = arith.constant 2.000000e+00 : f32
    %135 = vector.broadcast %cst_30 : f32 to vector<2x8xf32>
    %136 = arith.mulf %135, %134 : vector<2x8xf32>
    %cst_31 = arith.constant 1.000000e+00 : f32
    %137 = vector.broadcast %cst_31 : f32 to vector<2x8xf32>
    %138 = arith.subf %136, %137 : vector<2x8xf32>
    %139 = vector.extract_strided_slice %133 {offsets = [0, 8], sizes = [2, 8], strides = [1, 1]} : vector<2x32xf32> to vector<2x8xf32>
    %140 = arith.mulf %139, %122 : vector<2x8xf32>
    %141 = vector.extract_strided_slice %133 {offsets = [0, 0], sizes = [2, 8], strides = [1, 1]} : vector<2x32xf32> to vector<2x8xf32>
    %142 = arith.mulf %141, %138 : vector<2x8xf32>
    %143 = arith.addf %140, %142 : vector<2x8xf32>
    %144 = vector.extract_strided_slice %133 {offsets = [0, 24], sizes = [2, 8], strides = [1, 1]} : vector<2x32xf32> to vector<2x8xf32>
    %145 = math.tanh %143 : vector<2x8xf32>
    %146 = arith.mulf %144, %145 : vector<2x8xf32>
    %147 = vector.extract_strided_slice %18 {offsets = [12, 0], sizes = [2, 32], strides = [1, 1]} : vector<20x32xf32> to vector<2x32xf32>
    %cst_32 = arith.constant dense<0.000000e+00> : vector<2x32xf32>
    %148 = tpu.matmul %146, %5, %cst_32 {dimension_numbers = #tpu.dot_dimension_numbers<[1], [0], [0], [1], [0, 0, 1, 1], [], []>} : vector<2x8xf32>, vector<8x32xf32>, vector<2x32xf32> -> vector<2x32xf32>
    %149 = arith.addf %147, %148 : vector<2x32xf32>
    %150 = arith.negf %149 : vector<2x32xf32>
    %151 = math.exp %150 : vector<2x32xf32>
    %cst_33 = arith.constant 1.000000e+00 : f32
    %152 = vector.broadcast %cst_33 : f32 to vector<2x32xf32>
    %153 = arith.addf %152, %151 : vector<2x32xf32>
    %154 = arith.divf %152, %153 : vector<2x32xf32>
    %155 = vector.extract_strided_slice %154 {offsets = [0, 16], sizes = [2, 8], strides = [1, 1]} : vector<2x32xf32> to vector<2x8xf32>
    %cst_34 = arith.constant 2.000000e+00 : f32
    %156 = vector.broadcast %cst_34 : f32 to vector<2x8xf32>
    %157 = arith.mulf %156, %155 : vector<2x8xf32>
    %cst_35 = arith.constant 1.000000e+00 : f32
    %158 = vector.broadcast %cst_35 : f32 to vector<2x8xf32>
    %159 = arith.subf %157, %158 : vector<2x8xf32>
    %160 = vector.extract_strided_slice %154 {offsets = [0, 8], sizes = [2, 8], strides = [1, 1]} : vector<2x32xf32> to vector<2x8xf32>
    %161 = arith.mulf %160, %143 : vector<2x8xf32>
    %162 = vector.extract_strided_slice %154 {offsets = [0, 0], sizes = [2, 8], strides = [1, 1]} : vector<2x32xf32> to vector<2x8xf32>
    %163 = arith.mulf %162, %159 : vector<2x8xf32>
    %164 = arith.addf %161, %163 : vector<2x8xf32>
    %165 = vector.extract_strided_slice %154 {offsets = [0, 24], sizes = [2, 8], strides = [1, 1]} : vector<2x32xf32> to vector<2x8xf32>
    %166 = math.tanh %164 : vector<2x8xf32>
    %167 = arith.mulf %165, %166 : vector<2x8xf32>
    %168 = vector.extract_strided_slice %18 {offsets = [14, 0], sizes = [2, 32], strides = [1, 1]} : vector<20x32xf32> to vector<2x32xf32>
    %cst_36 = arith.constant dense<0.000000e+00> : vector<2x32xf32>
    %169 = tpu.matmul %167, %5, %cst_36 {dimension_numbers = #tpu.dot_dimension_numbers<[1], [0], [0], [1], [0, 0, 1, 1], [], []>} : vector<2x8xf32>, vector<8x32xf32>, vector<2x32xf32> -> vector<2x32xf32>
    %170 = arith.addf %168, %169 : vector<2x32xf32>
    %171 = arith.negf %170 : vector<2x32xf32>
    %172 = math.exp %171 : vector<2x32xf32>
    %cst_37 = arith.constant 1.000000e+00 : f32
    %173 = vector.broadcast %cst_37 : f32 to vector<2x32xf32>
    %174 = arith.addf %173, %172 : vector<2x32xf32>
    %175 = arith.divf %173, %174 : vector<2x32xf32>
    %176 = vector.extract_strided_slice %175 {offsets = [0, 16], sizes = [2, 8], strides = [1, 1]} : vector<2x32xf32> to vector<2x8xf32>
    %cst_38 = arith.constant 2.000000e+00 : f32
    %177 = vector.broadcast %cst_38 : f32 to vector<2x8xf32>
    %178 = arith.mulf %177, %176 : vector<2x8xf32>
    %cst_39 = arith.constant 1.000000e+00 : f32
    %179 = vector.broadcast %cst_39 : f32 to vector<2x8xf32>
    %180 = arith.subf %178, %179 : vector<2x8xf32>
    %181 = vector.extract_strided_slice %175 {offsets = [0, 8], sizes = [2, 8], strides = [1, 1]} : vector<2x32xf32> to vector<2x8xf32>
    %182 = arith.mulf %181, %164 : vector<2x8xf32>
    %183 = vector.extract_strided_slice %175 {offsets = [0, 0], sizes = [2, 8], strides = [1, 1]} : vector<2x32xf32> to vector<2x8xf32>
    %184 = arith.mulf %183, %180 : vector<2x8xf32>
    %185 = arith.addf %182, %184 : vector<2x8xf32>
    %186 = vector.extract_strided_slice %175 {offsets = [0, 24], sizes = [2, 8], strides = [1, 1]} : vector<2x32xf32> to vector<2x8xf32>
    %187 = math.tanh %185 : vector<2x8xf32>
    %188 = arith.mulf %186, %187 : vector<2x8xf32>
    %189 = vector.extract_strided_slice %18 {offsets = [16, 0], sizes = [2, 32], strides = [1, 1]} : vector<20x32xf32> to vector<2x32xf32>
    %cst_40 = arith.constant dense<0.000000e+00> : vector<2x32xf32>
    %190 = tpu.matmul %188, %5, %cst_40 {dimension_numbers = #tpu.dot_dimension_numbers<[1], [0], [0], [1], [0, 0, 1, 1], [], []>} : vector<2x8xf32>, vector<8x32xf32>, vector<2x32xf32> -> vector<2x32xf32>
    %191 = arith.addf %189, %190 : vector<2x32xf32>
    %192 = arith.negf %191 : vector<2x32xf32>
    %193 = math.exp %192 : vector<2x32xf32>
    %cst_41 = arith.constant 1.000000e+00 : f32
    %194 = vector.broadcast %cst_41 : f32 to vector<2x32xf32>
    %195 = arith.addf %194, %193 : vector<2x32xf32>
    %196 = arith.divf %194, %195 : vector<2x32xf32>
    %197 = vector.extract_strided_slice %196 {offsets = [0, 16], sizes = [2, 8], strides = [1, 1]} : vector<2x32xf32> to vector<2x8xf32>
    %cst_42 = arith.constant 2.000000e+00 : f32
    %198 = vector.broadcast %cst_42 : f32 to vector<2x8xf32>
    %199 = arith.mulf %198, %197 : vector<2x8xf32>
    %cst_43 = arith.constant 1.000000e+00 : f32
    %200 = vector.broadcast %cst_43 : f32 to vector<2x8xf32>
    %201 = arith.subf %199, %200 : vector<2x8xf32>
    %202 = vector.extract_strided_slice %196 {offsets = [0, 8], sizes = [2, 8], strides = [1, 1]} : vector<2x32xf32> to vector<2x8xf32>
    %203 = arith.mulf %202, %185 : vector<2x8xf32>
    %204 = vector.extract_strided_slice %196 {offsets = [0, 0], sizes = [2, 8], strides = [1, 1]} : vector<2x32xf32> to vector<2x8xf32>
    %205 = arith.mulf %204, %201 : vector<2x8xf32>
    %206 = arith.addf %203, %205 : vector<2x8xf32>
    %207 = vector.extract_strided_slice %196 {offsets = [0, 24], sizes = [2, 8], strides = [1, 1]} : vector<2x32xf32> to vector<2x8xf32>
    %208 = math.tanh %206 : vector<2x8xf32>
    %209 = arith.mulf %207, %208 : vector<2x8xf32>
    %210 = vector.extract_strided_slice %18 {offsets = [18, 0], sizes = [2, 32], strides = [1, 1]} : vector<20x32xf32> to vector<2x32xf32>
    %cst_44 = arith.constant dense<0.000000e+00> : vector<2x32xf32>
    %211 = tpu.matmul %209, %5, %cst_44 {dimension_numbers = #tpu.dot_dimension_numbers<[1], [0], [0], [1], [0, 0, 1, 1], [], []>} : vector<2x8xf32>, vector<8x32xf32>, vector<2x32xf32> -> vector<2x32xf32>
    %212 = arith.addf %210, %211 : vector<2x32xf32>
    %213 = arith.negf %212 : vector<2x32xf32>
    %214 = math.exp %213 : vector<2x32xf32>
    %cst_45 = arith.constant 1.000000e+00 : f32
    %215 = vector.broadcast %cst_45 : f32 to vector<2x32xf32>
    %216 = arith.addf %215, %214 : vector<2x32xf32>
    %217 = arith.divf %215, %216 : vector<2x32xf32>
    %218 = vector.extract_strided_slice %217 {offsets = [0, 16], sizes = [2, 8], strides = [1, 1]} : vector<2x32xf32> to vector<2x8xf32>
    %cst_46 = arith.constant 2.000000e+00 : f32
    %219 = vector.broadcast %cst_46 : f32 to vector<2x8xf32>
    %220 = arith.mulf %219, %218 : vector<2x8xf32>
    %cst_47 = arith.constant 1.000000e+00 : f32
    %221 = vector.broadcast %cst_47 : f32 to vector<2x8xf32>
    %222 = arith.subf %220, %221 : vector<2x8xf32>
    %223 = vector.extract_strided_slice %217 {offsets = [0, 8], sizes = [2, 8], strides = [1, 1]} : vector<2x32xf32> to vector<2x8xf32>
    %224 = arith.mulf %223, %206 : vector<2x8xf32>
    %225 = vector.extract_strided_slice %217 {offsets = [0, 0], sizes = [2, 8], strides = [1, 1]} : vector<2x32xf32> to vector<2x8xf32>
    %226 = arith.mulf %225, %222 : vector<2x8xf32>
    %227 = arith.addf %224, %226 : vector<2x8xf32>
    %228 = vector.extract_strided_slice %217 {offsets = [0, 24], sizes = [2, 8], strides = [1, 1]} : vector<2x32xf32> to vector<2x8xf32>
    %229 = math.tanh %227 : vector<2x8xf32>
    %230 = arith.mulf %228, %229 : vector<2x8xf32>
    %cst_48 = arith.constant dense<0.000000e+00> : vector<2x32xf32>
    %231 = tpu.matmul %230, %12, %cst_48 {dimension_numbers = #tpu.dot_dimension_numbers<[1], [0], [0], [1], [0, 0, 1, 1], [], []>} : vector<2x8xf32>, vector<8x32xf32>, vector<2x32xf32> -> vector<2x32xf32>
    %232 = vector.broadcast %14 : vector<1x32xf32> to vector<2x32xf32>
    %233 = arith.addf %231, %232 : vector<2x32xf32>
    %234 = arith.negf %233 : vector<2x32xf32>
    %235 = math.exp %234 : vector<2x32xf32>
    %cst_49 = arith.constant 1.000000e+00 : f32
    %236 = vector.broadcast %cst_49 : f32 to vector<2x32xf32>
    %237 = arith.addf %236, %235 : vector<2x32xf32>
    %238 = arith.divf %236, %237 : vector<2x32xf32>
    %239 = vector.extract_strided_slice %238 {offsets = [0, 16], sizes = [2, 8], strides = [1, 1]} : vector<2x32xf32> to vector<2x8xf32>
    %cst_50 = arith.constant 2.000000e+00 : f32
    %240 = vector.broadcast %cst_50 : f32 to vector<2x8xf32>
    %241 = arith.mulf %240, %239 : vector<2x8xf32>
    %cst_51 = arith.constant 1.000000e+00 : f32
    %242 = vector.broadcast %cst_51 : f32 to vector<2x8xf32>
    %243 = arith.subf %241, %242 : vector<2x8xf32>
    %244 = vector.extract_strided_slice %238 {offsets = [0, 8], sizes = [2, 8], strides = [1, 1]} : vector<2x32xf32> to vector<2x8xf32>
    %245 = arith.mulf %244, %227 : vector<2x8xf32>
    %246 = vector.extract_strided_slice %238 {offsets = [0, 0], sizes = [2, 8], strides = [1, 1]} : vector<2x32xf32> to vector<2x8xf32>
    %247 = arith.mulf %246, %243 : vector<2x8xf32>
    %248 = arith.addf %245, %247 : vector<2x8xf32>
    %249 = vector.extract_strided_slice %238 {offsets = [0, 24], sizes = [2, 8], strides = [1, 1]} : vector<2x32xf32> to vector<2x8xf32>
    %250 = math.tanh %248 : vector<2x8xf32>
    %251 = arith.mulf %249, %250 : vector<2x8xf32>
    %cst_52 = arith.constant dense<0.000000e+00> : vector<2x32xf32>
    %252 = tpu.matmul %251, %12, %cst_52 {dimension_numbers = #tpu.dot_dimension_numbers<[1], [0], [0], [1], [0, 0, 1, 1], [], []>} : vector<2x8xf32>, vector<8x32xf32>, vector<2x32xf32> -> vector<2x32xf32>
    %253 = vector.broadcast %14 : vector<1x32xf32> to vector<2x32xf32>
    %254 = arith.addf %252, %253 : vector<2x32xf32>
    %255 = arith.negf %254 : vector<2x32xf32>
    %256 = math.exp %255 : vector<2x32xf32>
    %cst_53 = arith.constant 1.000000e+00 : f32
    %257 = vector.broadcast %cst_53 : f32 to vector<2x32xf32>
    %258 = arith.addf %257, %256 : vector<2x32xf32>
    %259 = arith.divf %257, %258 : vector<2x32xf32>
    %260 = vector.extract_strided_slice %259 {offsets = [0, 16], sizes = [2, 8], strides = [1, 1]} : vector<2x32xf32> to vector<2x8xf32>
    %cst_54 = arith.constant 2.000000e+00 : f32
    %261 = vector.broadcast %cst_54 : f32 to vector<2x8xf32>
    %262 = arith.mulf %261, %260 : vector<2x8xf32>
    %cst_55 = arith.constant 1.000000e+00 : f32
    %263 = vector.broadcast %cst_55 : f32 to vector<2x8xf32>
    %264 = arith.subf %262, %263 : vector<2x8xf32>
    %265 = vector.extract_strided_slice %259 {offsets = [0, 8], sizes = [2, 8], strides = [1, 1]} : vector<2x32xf32> to vector<2x8xf32>
    %266 = arith.mulf %265, %248 : vector<2x8xf32>
    %267 = vector.extract_strided_slice %259 {offsets = [0, 0], sizes = [2, 8], strides = [1, 1]} : vector<2x32xf32> to vector<2x8xf32>
    %268 = arith.mulf %267, %264 : vector<2x8xf32>
    %269 = arith.addf %266, %268 : vector<2x8xf32>
    %270 = vector.extract_strided_slice %259 {offsets = [0, 24], sizes = [2, 8], strides = [1, 1]} : vector<2x32xf32> to vector<2x8xf32>
    %271 = math.tanh %269 : vector<2x8xf32>
    %272 = arith.mulf %270, %271 : vector<2x8xf32>
    %cst_56 = arith.constant dense<0.000000e+00> : vector<2x32xf32>
    %273 = tpu.matmul %272, %12, %cst_56 {dimension_numbers = #tpu.dot_dimension_numbers<[1], [0], [0], [1], [0, 0, 1, 1], [], []>} : vector<2x8xf32>, vector<8x32xf32>, vector<2x32xf32> -> vector<2x32xf32>
    %274 = vector.broadcast %14 : vector<1x32xf32> to vector<2x32xf32>
    %275 = arith.addf %273, %274 : vector<2x32xf32>
    %276 = arith.negf %275 : vector<2x32xf32>
    %277 = math.exp %276 : vector<2x32xf32>
    %cst_57 = arith.constant 1.000000e+00 : f32
    %278 = vector.broadcast %cst_57 : f32 to vector<2x32xf32>
    %279 = arith.addf %278, %277 : vector<2x32xf32>
    %280 = arith.divf %278, %279 : vector<2x32xf32>
    %281 = vector.extract_strided_slice %280 {offsets = [0, 16], sizes = [2, 8], strides = [1, 1]} : vector<2x32xf32> to vector<2x8xf32>
    %cst_58 = arith.constant 2.000000e+00 : f32
    %282 = vector.broadcast %cst_58 : f32 to vector<2x8xf32>
    %283 = arith.mulf %282, %281 : vector<2x8xf32>
    %cst_59 = arith.constant 1.000000e+00 : f32
    %284 = vector.broadcast %cst_59 : f32 to vector<2x8xf32>
    %285 = arith.subf %283, %284 : vector<2x8xf32>
    %286 = vector.extract_strided_slice %280 {offsets = [0, 8], sizes = [2, 8], strides = [1, 1]} : vector<2x32xf32> to vector<2x8xf32>
    %287 = arith.mulf %286, %269 : vector<2x8xf32>
    %288 = vector.extract_strided_slice %280 {offsets = [0, 0], sizes = [2, 8], strides = [1, 1]} : vector<2x32xf32> to vector<2x8xf32>
    %289 = arith.mulf %288, %285 : vector<2x8xf32>
    %290 = arith.addf %287, %289 : vector<2x8xf32>
    %291 = vector.extract_strided_slice %280 {offsets = [0, 24], sizes = [2, 8], strides = [1, 1]} : vector<2x32xf32> to vector<2x8xf32>
    %292 = math.tanh %290 : vector<2x8xf32>
    %293 = arith.mulf %291, %292 : vector<2x8xf32>
    %cst_60 = arith.constant dense<0.000000e+00> : vector<2x32xf32>
    %294 = tpu.matmul %293, %12, %cst_60 {dimension_numbers = #tpu.dot_dimension_numbers<[1], [0], [0], [1], [0, 0, 1, 1], [], []>} : vector<2x8xf32>, vector<8x32xf32>, vector<2x32xf32> -> vector<2x32xf32>
    %295 = vector.broadcast %14 : vector<1x32xf32> to vector<2x32xf32>
    %296 = arith.addf %294, %295 : vector<2x32xf32>
    %297 = arith.negf %296 : vector<2x32xf32>
    %298 = math.exp %297 : vector<2x32xf32>
    %cst_61 = arith.constant 1.000000e+00 : f32
    %299 = vector.broadcast %cst_61 : f32 to vector<2x32xf32>
    %300 = arith.addf %299, %298 : vector<2x32xf32>
    %301 = arith.divf %299, %300 : vector<2x32xf32>
    %302 = vector.extract_strided_slice %301 {offsets = [0, 16], sizes = [2, 8], strides = [1, 1]} : vector<2x32xf32> to vector<2x8xf32>
    %cst_62 = arith.constant 2.000000e+00 : f32
    %303 = vector.broadcast %cst_62 : f32 to vector<2x8xf32>
    %304 = arith.mulf %303, %302 : vector<2x8xf32>
    %cst_63 = arith.constant 1.000000e+00 : f32
    %305 = vector.broadcast %cst_63 : f32 to vector<2x8xf32>
    %306 = arith.subf %304, %305 : vector<2x8xf32>
    %307 = vector.extract_strided_slice %301 {offsets = [0, 8], sizes = [2, 8], strides = [1, 1]} : vector<2x32xf32> to vector<2x8xf32>
    %308 = arith.mulf %307, %290 : vector<2x8xf32>
    %309 = vector.extract_strided_slice %301 {offsets = [0, 0], sizes = [2, 8], strides = [1, 1]} : vector<2x32xf32> to vector<2x8xf32>
    %310 = arith.mulf %309, %306 : vector<2x8xf32>
    %311 = arith.addf %308, %310 : vector<2x8xf32>
    %312 = vector.extract_strided_slice %301 {offsets = [0, 24], sizes = [2, 8], strides = [1, 1]} : vector<2x32xf32> to vector<2x8xf32>
    %313 = math.tanh %311 : vector<2x8xf32>
    %314 = arith.mulf %312, %313 : vector<2x8xf32>
    %cst_64 = arith.constant dense<0.000000e+00> : vector<2x32xf32>
    %315 = tpu.matmul %314, %12, %cst_64 {dimension_numbers = #tpu.dot_dimension_numbers<[1], [0], [0], [1], [0, 0, 1, 1], [], []>} : vector<2x8xf32>, vector<8x32xf32>, vector<2x32xf32> -> vector<2x32xf32>
    %316 = vector.broadcast %14 : vector<1x32xf32> to vector<2x32xf32>
    %317 = arith.addf %315, %316 : vector<2x32xf32>
    %318 = arith.negf %317 : vector<2x32xf32>
    %319 = math.exp %318 : vector<2x32xf32>
    %cst_65 = arith.constant 1.000000e+00 : f32
    %320 = vector.broadcast %cst_65 : f32 to vector<2x32xf32>
    %321 = arith.addf %320, %319 : vector<2x32xf32>
    %322 = arith.divf %320, %321 : vector<2x32xf32>
    %323 = vector.extract_strided_slice %322 {offsets = [0, 16], sizes = [2, 8], strides = [1, 1]} : vector<2x32xf32> to vector<2x8xf32>
    %cst_66 = arith.constant 2.000000e+00 : f32
    %324 = vector.broadcast %cst_66 : f32 to vector<2x8xf32>
    %325 = arith.mulf %324, %323 : vector<2x8xf32>
    %cst_67 = arith.constant 1.000000e+00 : f32
    %326 = vector.broadcast %cst_67 : f32 to vector<2x8xf32>
    %327 = arith.subf %325, %326 : vector<2x8xf32>
    %328 = vector.extract_strided_slice %322 {offsets = [0, 8], sizes = [2, 8], strides = [1, 1]} : vector<2x32xf32> to vector<2x8xf32>
    %329 = arith.mulf %328, %311 : vector<2x8xf32>
    %330 = vector.extract_strided_slice %322 {offsets = [0, 0], sizes = [2, 8], strides = [1, 1]} : vector<2x32xf32> to vector<2x8xf32>
    %331 = arith.mulf %330, %327 : vector<2x8xf32>
    %332 = arith.addf %329, %331 : vector<2x8xf32>
    %333 = vector.extract_strided_slice %322 {offsets = [0, 24], sizes = [2, 8], strides = [1, 1]} : vector<2x32xf32> to vector<2x8xf32>
    %334 = math.tanh %332 : vector<2x8xf32>
    %335 = arith.mulf %333, %334 : vector<2x8xf32>
    %cst_68 = arith.constant dense<0.000000e+00> : vector<2x32xf32>
    %336 = tpu.matmul %335, %12, %cst_68 {dimension_numbers = #tpu.dot_dimension_numbers<[1], [0], [0], [1], [0, 0, 1, 1], [], []>} : vector<2x8xf32>, vector<8x32xf32>, vector<2x32xf32> -> vector<2x32xf32>
    %337 = vector.broadcast %14 : vector<1x32xf32> to vector<2x32xf32>
    %338 = arith.addf %336, %337 : vector<2x32xf32>
    %339 = arith.negf %338 : vector<2x32xf32>
    %340 = math.exp %339 : vector<2x32xf32>
    %cst_69 = arith.constant 1.000000e+00 : f32
    %341 = vector.broadcast %cst_69 : f32 to vector<2x32xf32>
    %342 = arith.addf %341, %340 : vector<2x32xf32>
    %343 = arith.divf %341, %342 : vector<2x32xf32>
    %344 = vector.extract_strided_slice %343 {offsets = [0, 16], sizes = [2, 8], strides = [1, 1]} : vector<2x32xf32> to vector<2x8xf32>
    %cst_70 = arith.constant 2.000000e+00 : f32
    %345 = vector.broadcast %cst_70 : f32 to vector<2x8xf32>
    %346 = arith.mulf %345, %344 : vector<2x8xf32>
    %cst_71 = arith.constant 1.000000e+00 : f32
    %347 = vector.broadcast %cst_71 : f32 to vector<2x8xf32>
    %348 = arith.subf %346, %347 : vector<2x8xf32>
    %349 = vector.extract_strided_slice %343 {offsets = [0, 8], sizes = [2, 8], strides = [1, 1]} : vector<2x32xf32> to vector<2x8xf32>
    %350 = arith.mulf %349, %332 : vector<2x8xf32>
    %351 = vector.extract_strided_slice %343 {offsets = [0, 0], sizes = [2, 8], strides = [1, 1]} : vector<2x32xf32> to vector<2x8xf32>
    %352 = arith.mulf %351, %348 : vector<2x8xf32>
    %353 = arith.addf %350, %352 : vector<2x8xf32>
    %354 = vector.extract_strided_slice %343 {offsets = [0, 24], sizes = [2, 8], strides = [1, 1]} : vector<2x32xf32> to vector<2x8xf32>
    %355 = math.tanh %353 : vector<2x8xf32>
    %356 = arith.mulf %354, %355 : vector<2x8xf32>
    %357 = tpu.concatenate %251, %272, %293, %314, %335, %356 in 0 : vector<2x8xf32>, vector<2x8xf32>, vector<2x8xf32>, vector<2x8xf32>, vector<2x8xf32>, vector<2x8xf32> -> vector<12x8xf32>
    %cst_72 = arith.constant dense<0.000000e+00> : vector<12x8xf32>
    %358 = tpu.matmul %357, %8, %cst_72 {dimension_numbers = #tpu.dot_dimension_numbers<[1], [0], [0], [1], [0, 0, 1, 1], [], []>} : vector<12x8xf32>, vector<8x8xf32>, vector<12x8xf32> -> vector<12x8xf32>
    %359 = vector.broadcast %9 : vector<1x8xf32> to vector<12x8xf32>
    %360 = arith.addf %358, %359 : vector<12x8xf32>
    %361 = vector.extract_strided_slice %360 {offsets = [0, 0], sizes = [2, 8], strides = [1, 1]} : vector<12x8xf32> to vector<2x8xf32>
    %c0_73 = arith.constant 0 : index
    %c0_74 = arith.constant 0 : index
    %c0_75 = arith.constant 0 : index
    %362 = vector.load %arg3[%c0_73, %c0_74, %c0_75] : memref<6x2x8xf32, #tpu.memory_space<vmem>>, vector<1x2x8xf32>
    %363 = vector.shape_cast %362 : vector<1x2x8xf32> to vector<2x8xf32>
    %364 = vector.shape_cast %361 : vector<2x8xf32> to vector<1x2x8xf32>
    tpu.vector_store %arg3[%c0_73, %c0_74, %c0_75], %364 {strides = array<i32>} : memref<6x2x8xf32, #tpu.memory_space<vmem>>, vector<1x2x8xf32>,
    %365 = vector.extract_strided_slice %360 {offsets = [2, 0], sizes = [2, 8], strides = [1, 1]} : vector<12x8xf32> to vector<2x8xf32>
    %c1 = arith.constant 1 : index
    %c0_76 = arith.constant 0 : index
    %c0_77 = arith.constant 0 : index
    %366 = vector.load %arg3[%c1, %c0_76, %c0_77] : memref<6x2x8xf32, #tpu.memory_space<vmem>>, vector<1x2x8xf32>
    %367 = vector.shape_cast %366 : vector<1x2x8xf32> to vector<2x8xf32>
    %368 = vector.shape_cast %365 : vector<2x8xf32> to vector<1x2x8xf32>
    tpu.vector_store %arg3[%c1, %c0_76, %c0_77], %368 {strides = array<i32>} : memref<6x2x8xf32, #tpu.memory_space<vmem>>, vector<1x2x8xf32>,
    %369 = vector.extract_strided_slice %360 {offsets = [4, 0], sizes = [2, 8], strides = [1, 1]} : vector<12x8xf32> to vector<2x8xf32>
    %c2 = arith.constant 2 : index
    %c0_78 = arith.constant 0 : index
    %c0_79 = arith.constant 0 : index
    %370 = vector.load %arg3[%c2, %c0_78, %c0_79] : memref<6x2x8xf32, #tpu.memory_space<vmem>>, vector<1x2x8xf32>
    %371 = vector.shape_cast %370 : vector<1x2x8xf32> to vector<2x8xf32>
    %372 = vector.shape_cast %369 : vector<2x8xf32> to vector<1x2x8xf32>
    tpu.vector_store %arg3[%c2, %c0_78, %c0_79], %372 {strides = array<i32>} : memref<6x2x8xf32, #tpu.memory_space<vmem>>, vector<1x2x8xf32>,
    %373 = vector.extract_strided_slice %360 {offsets = [6, 0], sizes = [2, 8], strides = [1, 1]} : vector<12x8xf32> to vector<2x8xf32>
    %c3 = arith.constant 3 : index
    %c0_80 = arith.constant 0 : index
    %c0_81 = arith.constant 0 : index
    %374 = vector.load %arg3[%c3, %c0_80, %c0_81] : memref<6x2x8xf32, #tpu.memory_space<vmem>>, vector<1x2x8xf32>
    %375 = vector.shape_cast %374 : vector<1x2x8xf32> to vector<2x8xf32>
    %376 = vector.shape_cast %373 : vector<2x8xf32> to vector<1x2x8xf32>
    tpu.vector_store %arg3[%c3, %c0_80, %c0_81], %376 {strides = array<i32>} : memref<6x2x8xf32, #tpu.memory_space<vmem>>, vector<1x2x8xf32>,
    %377 = vector.extract_strided_slice %360 {offsets = [8, 0], sizes = [2, 8], strides = [1, 1]} : vector<12x8xf32> to vector<2x8xf32>
    %c4 = arith.constant 4 : index
    %c0_82 = arith.constant 0 : index
    %c0_83 = arith.constant 0 : index
    %378 = vector.load %arg3[%c4, %c0_82, %c0_83] : memref<6x2x8xf32, #tpu.memory_space<vmem>>, vector<1x2x8xf32>
    %379 = vector.shape_cast %378 : vector<1x2x8xf32> to vector<2x8xf32>
    %380 = vector.shape_cast %377 : vector<2x8xf32> to vector<1x2x8xf32>
    tpu.vector_store %arg3[%c4, %c0_82, %c0_83], %380 {strides = array<i32>} : memref<6x2x8xf32, #tpu.memory_space<vmem>>, vector<1x2x8xf32>,
    %381 = vector.extract_strided_slice %360 {offsets = [10, 0], sizes = [2, 8], strides = [1, 1]} : vector<12x8xf32> to vector<2x8xf32>
    %c5 = arith.constant 5 : index
    %c0_84 = arith.constant 0 : index
    %c0_85 = arith.constant 0 : index
    %382 = vector.load %arg3[%c5, %c0_84, %c0_85] : memref<6x2x8xf32, #tpu.memory_space<vmem>>, vector<1x2x8xf32>
    %383 = vector.shape_cast %382 : vector<1x2x8xf32> to vector<2x8xf32>
    %384 = vector.shape_cast %381 : vector<2x8xf32> to vector<1x2x8xf32>
    tpu.vector_store %arg3[%c5, %c0_84, %c0_85], %384 {strides = array<i32>} : memref<6x2x8xf32, #tpu.memory_space<vmem>>, vector<1x2x8xf32>,
    return
  }
}

</mosaic_0001>

<bundles_post_ra>
// kernel: lstm_forward_pallas.1
= control target key start
LH: loop header
LB: loop body
LE: loop exit
PB: predicated region body
PF: predicated region fallthrough
CT: control target
= control target key end

     0   :  { %vm22_vm0 = vcmask 64512   ;;  %s1658_s0 = inlined_call_operand.vmem [shape: f32[20,8], index: 0, kind: input, shape index: {}]   ;;  %s1659_s1 = inlined_call_operand.vmem [shape: f32[8,32], index: 1, kind: input, shape index: {}]   ;;  %s1660_s2 = inlined_call_operand.vmem [shape: f32[26,32], index: 2, kind: input, shape index: {}]   ;;  %s1661_s3 = inlined_call_operand.hbm [shape: f32[6,2,8], index: 3, kind: output, shape index: {}]  }
   0x1   :  { %v15_v0 = vld [vmem:[%s1659_s1] sm:$0xff]  ;;  %v17_v2 = vld [vmem:[%s1660_s2 + $0x8] sm:$0xff]  ;;  %v58_v5 = vld [vmem:[%s1658_s0 + $0x10] sm:$0xf] }
   0x2   :  { %v16_v1 = vld [vmem:[%s1660_s2] sm:$0xff]  ;;  %v1476_v4 = vmul.f32 %v17_v2, %v15_v0 }
   0x3   :  { %v20_v3 = vmul.f32 %v16_v1, %v15_v0  ;;  %v56_v6 = vld [vmem:[%s1658_s0] sm:$0xff] }
   0x4   :  { %8 = vsyncpa [#allocation3], 0  ;;  %177 = vmatpush.msra.mxu3 %v1476_v4  ;;  %v1439_v7 = vmov 0.0   ;;  %v1496_v8 = vld [vmem:[%s1660_s2 + $0x18] sm:$0x3]  ;;  %s1440_s23 = smov 112  }
   0x5   :  { %1307 = vmatpush.msra.mxu2 %v20_v3  ;;  %84 = vmatpush.msra.mxu1 %v20_v3  ;;  %v1501_v11 = vperm.slane %v1496_v8, 1  ;;  %s1441_s24 = smov 8   ;;  %s1442_s25 = smov 16  }
   0x6   :  { %1257 = vmatmul.msk.f32.vlgmr.msra.gmra.mxu2 %vm22_vm0, %v58_v5  ;;  %1255 = vmatmul.msk.f32.vlgmr.msra.gmra.mxu1 %vm22_vm0, %v56_v6  ;;  %s1443_s26 = smov 104   ;;  %s1241_s8 = sshll.u32 %s1661_s3, 4  ;;  %s1242_s8 = int_to_ptr.hbm [resolvable:$true] %s1241_s8 }
   0x7   :  { %113 = vmatpush.msrb.mxu2 %v1476_v4  ;;  %319 = vmatpush.msrb.mxu3 %v1476_v4  ;;  %s1445_s9 = smov 32   ;;  %s1446_s10 = smov 2  }
   0x8   :  { %44 = vmatpush.msra.mxu0 %v20_v3  ;;  %670 = vmatpush.msrb.mxu1 %v1476_v4 }
   0x9   :  { %248 = vmatpush.msra.mxu2 %v1476_v4 }
   0xa   :  { %390 = vmatpush.msrb.mxu0 %v1476_v4 }
   0xe   :  { %114 = vmatmul.f32.vlgmr.msrb.gmra.mxu2 %v1439_v7 }
   0xf   :  { %457 = vmatpush.msrb.mxu2 %v1476_v4 }
  0x83   :  { %v86_v10 = vpop.f32.mrf.mxu1 }
  0x84   :  { %v1504_v12 = vadd.f32 %v86_v10, %v1501_v11 }
  0x89   :  { %v1498_v9 = vpop.f32.mrf.mxu2 }
  0x91   :  { %v115_v13 = vpop.f32.mrf.mxu2 }
  0x92   :  { %v118_v14 = vadd.f32 %v115_v13, %v1504_v12 }
  0x94   :  { %v1258_v15 = vmul.f32 -1.442695, %v118_v14 }
  0x96   :  { %1316 = vpow2.f32 %v1258_v15 }
  0x9c   :  { %v1317_v16 = vpop.eup %1316 }
  0x9d   :  { %v122_v17 = vadd.f32 1.0, %v1317_v16 }
  0x9f   :  { %1318 = vrcp.f32 %v122_v17  ;;  %v134_v21 = vand.u32 2147483648, %v122_v17  ;;  %v132_v23 = vand.u32 2147483647, %v122_v17  ;;  %vm128_vm2 = vweird.f32 %v122_v17 }
  0xa1   :  { %v135_v25 = vor.u32 1.1754944e-38, %v134_v21  ;;  %vm133_vm4 = vcmp.eq.f32.partialorder %v132_v23, 8.507059e+37 }
  0xa5   :  { %v1319_v18 = vpop.eup %1318 }
  0xa6   :  { %v124_v19 = vmul.f32 %v1319_v18, %v122_v17  ;;  %vm129_vm1 = vweird.f32 %v1319_v18 }
  0xa7   :  { %vm130_vm3 = vmor %vm128_vm2, %vm129_vm1 }
  0xa8   :  { %v125_v20 = vsub.f32 1.0, %v124_v19 }
  0xaa   :  { %v126_v22 = vmul.f32 %v1319_v18, %v125_v20 }
  0xac   :  { %v127_v24 = vadd.f32 %v1319_v18, %v126_v22 }
  0xae   :  { %v131_v26 = vsel %vm130_vm3, %v1319_v18, %v127_v24 }
  0xaf   :  { %v136_v27 = vsel %vm133_vm4, %v135_v25, %v131_v26 }
  0xb0   :  { %v138_v28 = vmul.f32 2.0, %v136_v27  ;;  %v140_v32 = vmul.f32 0.0, %v136_v27 }
  0xb2   :  { %v1259_v29 = vadd.f32 -1.0, %v138_v28 }
  0xb4   :  { %142 = vrot.lane.b32.xlu0 %v1259_v29, %s1440_s23 }
 0x126   :  { %v143_v30 = vpop.permute.xlu0 %142 }
 0x127   :  { %v145_v31 = vmul.f32 %v143_v30, %v136_v27 }
 0x129   :  { %147 = vrot.lane.b32.xlu0 %v145_v31, %s1441_s24 }
 0x19b   :  { %v148_v33 = vpop.permute.xlu0 %147 }
 0x19c   :  { %v150_v34 = vadd.f32 %v148_v33, %v140_v32 }
 0x19e   :  { %1320 = vtanh.f32 %v150_v34  ;;  %v208_v59 = vrot.slane %v150_v34, 6 }
 0x1a4   :  { %v1321_v35 = vpop.eup %1320 }
 0x1a5   :  { %153 = vrot.lane.b32.xlu1 %v1321_v35, %s1442_s25 }
 0x217   :  { %v154_v36 = vpop.permute.xlu1 %153 }
 0x218   :  { %v156_v37 = vmul.f32 %v154_v36, %v136_v27 }
 0x21a   :  { %158 = vrot.lane.b32.xlu1 %v156_v37, %s1443_s26 }
 0x28c   :  { %v159_v38 = vpop.permute.xlu1 %158 }
 0x28d   :  { %1260 = vmatmul.msk.f32.vlgmr.msra.gmra.mxu3 %vm22_vm0, %v159_v38 }
 0x28e   :  { %528 = vmatpush.msra.mxu3 %v1476_v4 }
 0x310   :  { %v179_v39 = vpop.f32.mrf.mxu3 }
 0x311   :  { %v183_v40 = vrot.slane %v179_v39, 6 }
 0x313   :  { %v185_v41 = vadd.f32 %v183_v40, %v1504_v12 }
 0x315   :  { %v1261_v42 = vmul.f32 -1.442695, %v185_v41 }
 0x317   :  { %1322 = vpow2.f32 %v1261_v42 }
 0x31d   :  { %v1323_v43 = vpop.eup %1322 }
 0x31e   :  { %v189_v44 = vadd.f32 1.0, %v1323_v43 }
 0x320   :  { %1324 = vrcp.f32 %v189_v44  ;;  %v201_v48 = vand.u32 2147483648, %v189_v44  ;;  %v199_v50 = vand.u32 2147483647, %v189_v44  ;;  %vm195_vm6 = vweird.f32 %v189_v44 }
 0x322   :  { %v202_v52 = vor.u32 1.1754944e-38, %v201_v48  ;;  %vm200_vm8 = vcmp.eq.f32.partialorder %v199_v50, 8.507059e+37 }
 0x326   :  { %v1325_v45 = vpop.eup %1324 }
 0x327   :  { %v191_v46 = vmul.f32 %v1325_v45, %v189_v44  ;;  %vm196_vm5 = vweird.f32 %v1325_v45 }
 0x328   :  { %vm197_vm7 = vmor %vm195_vm6, %vm196_vm5 }
 0x329   :  { %v192_v47 = vsub.f32 1.0, %v191_v46 }
 0x32b   :  { %v193_v49 = vmul.f32 %v1325_v45, %v192_v47 }
 0x32d   :  { %v194_v51 = vadd.f32 %v1325_v45, %v193_v49 }
 0x32f   :  { %v198_v53 = vsel %vm197_vm7, %v1325_v45, %v194_v51 }
 0x330   :  { %v203_v54 = vsel %vm200_vm8, %v202_v52, %v198_v53 }
 0x331   :  { %v205_v55 = vmul.f32 2.0, %v203_v54  ;;  %v210_v60 = vmul.f32 %v208_v59, %v203_v54 }
 0x333   :  { %v1262_v56 = vadd.f32 -1.0, %v205_v55 }
 0x335   :  { %212 = vrot.lane.b32.xlu2 %v1262_v56, %s1440_s23 }
 0x38f   :  { %v213_v57 = vpop.permute.xlu2 %212 }
 0x390   :  { %v215_v58 = vmul.f32 %v213_v57, %v203_v54 }
 0x392   :  { %217 = vrot.lane.b32.xlu2 %v215_v58, %s1441_s24 }
 0x3ec   :  { %v218_v61 = vpop.permute.xlu2 %217 }
 0x3ed   :  { %v220_v62 = vadd.f32 %v218_v61, %v210_v60 }
 0x3ef   :  { %1326 = vtanh.f32 %v220_v62  ;;  %v279_v29 = vrot.slane %v220_v62, 6  ;;  %v1533_v62 = vld [vmem:[%s1660_s2 + $0x10] sm:$0xff] }
 0x3f0   :  { %1253 = vmatmul.msk.f32.vlgmr.msra.gmra.mxu0 %vm22_vm0, %v1533_v62 }
 0x3f1   :  { %599 = vmatpush.msra.mxu0 %v1476_v4 }
 0x3f5   :  { %v1327_v63 = vpop.eup %1326 }
 0x3f6   :  { %223 = vrot.lane.b32.xlu0 %v1327_v63, %s1442_s25  ;;  %v57_v63 = vld [vmem:[%s1658_s0 + $0x8] sm:$0xff] }
 0x3f7   :  { %1256 = vmatmul.msk.f32.gmra.mxu1 %vm22_vm0, %v57_v63 }
 0x3f8   :  { %1254 = vmatmul.msk.f32.gmra.mxu0 %vm22_vm0, %v1496_v8 }
 0x468   :  { %v224_v0 = vpop.permute.xlu0 %223 }
 0x469   :  { %v226_v1 = vmul.f32 %v224_v0, %v203_v54 }
 0x46b   :  { %v228_v2 = vrot.slane %v226_v1, 2 }
 0x46d   :  { %229 = vrot.lane.b32.xlu1 %v228_v2, %s1443_s26 }
 0x4df   :  { %v230_v3 = vpop.permute.xlu1 %229 }
 0x4e0   :  { %1263 = vmatmul.msk.f32.vlgmr.msra.gmra.mxu2 %vm22_vm0, %v230_v3  ;;  %v46_v3 = vpop.f32.mrf.mxu0 }
 0x4e1   :  { %737 = vmatpush.msra.mxu2 %v1476_v4 }
 0x563   :  { %v250_v5 = vpop.f32.mrf.mxu2 }
 0x564   :  { %v254_v6 = vrot.slane %v250_v5, 4  ;;  %v1546_v5 = vadd.f32 %v46_v3, %v1476_v4 }
 0x566   :  { %v256_v7 = vadd.f32 %v254_v6, %v1504_v12  ;;  %938 = vmatpush.msra.mxu1 %v1546_v5 }
 0x568   :  { %v1264_v10 = vmul.f32 -1.442695, %v256_v7  ;;  %v1552_v7 = vpop.f32.mrf.mxu0 }
 0x56a   :  { %1328 = vpow2.f32 %v1264_v10  ;;  %v89_v10 = vpop.f32.mrf.mxu1 }
 0x570   :  { %v1329_v13 = vpop.eup %1328 }
 0x571   :  { %v260_v14 = vadd.f32 1.0, %v1329_v13  ;;  %v1555_v13 = vadd.f32 %v89_v10, %v1501_v11 }
 0x573   :  { %1330 = vrcp.f32 %v260_v14  ;;  %v272_v18 = vand.u32 2147483648, %v260_v14  ;;  %v270_v20 = vand.u32 2147483647, %v260_v14  ;;  %vm266_vm10 = vweird.f32 %v260_v14 }
 0x575   :  { %v273_v22 = vor.u32 1.1754944e-38, %v272_v18  ;;  %vm271_vm12 = vcmp.eq.f32.partialorder %v270_v20, 8.507059e+37 }
 0x579   :  { %v1331_v15 = vpop.eup %1330 }
 0x57a   :  { %v262_v16 = vmul.f32 %v1331_v15, %v260_v14  ;;  %vm267_vm9 = vweird.f32 %v1331_v15 }
 0x57b   :  { %vm268_vm11 = vmor %vm266_vm10, %vm267_vm9 }
 0x57c   :  { %v263_v17 = vsub.f32 1.0, %v262_v16 }
 0x57e   :  { %v264_v19 = vmul.f32 %v1331_v15, %v263_v17 }
 0x580   :  { %v265_v21 = vadd.f32 %v1331_v15, %v264_v19 }
 0x582   :  { %v269_v23 = vsel %vm268_vm11, %v1331_v15, %v265_v21 }
 0x583   :  { %v274_v24 = vsel %vm271_vm12, %v273_v22, %v269_v23 }
 0x584   :  { %v276_v25 = vmul.f32 2.0, %v274_v24  ;;  %v281_v30 = vmul.f32 %v279_v29, %v274_v24 }
 0x586   :  { %v1265_v26 = vadd.f32 -1.0, %v276_v25 }
 0x588   :  { %283 = vrot.lane.b32.xlu2 %v1265_v26, %s1440_s23 }
 0x5e2   :  { %v284_v27 = vpop.permute.xlu2 %283 }
 0x5e3   :  { %v286_v28 = vmul.f32 %v284_v27, %v274_v24 }
 0x5e5   :  { %288 = vrot.lane.b32.xlu0 %v286_v28, %s1441_s24 }
 0x657   :  { %v289_v31 = vpop.permute.xlu0 %288 }
 0x658   :  { %v291_v32 = vadd.f32 %v289_v31, %v281_v30 }
 0x65a   :  { %1332 = vtanh.f32 %v291_v32  ;;  %v350_v57 = vrot.slane %v291_v32, 6 }
 0x660   :  { %v1333_v33 = vpop.eup %1332 }
 0x661   :  { %294 = vrot.lane.b32.xlu1 %v1333_v33, %s1442_s25 }
 0x6d3   :  { %v295_v34 = vpop.permute.xlu1 %294 }
 0x6d4   :  { %v297_v35 = vmul.f32 %v295_v34, %v274_v24 }
 0x6d6   :  { %v299_v36 = vrot.slane %v297_v35, 4 }
 0x6d8   :  { %300 = vrot.lane.b32.xlu2 %v299_v36, %s1443_s26 }
 0x732   :  { %v301_v37 = vpop.permute.xlu2 %300 }
 0x733   :  { %1266 = vmatmul.msk.f32.vlgmr.msrb.gmra.mxu3 %vm22_vm0, %v301_v37 }
 0x734   :  { %809 = vmatpush.msrb.mxu3 %v1546_v5 }
 0x7b6   :  { %v321_v38 = vpop.f32.mrf.mxu3 }
 0x7b7   :  { %v325_v39 = vrot.slane %v321_v38, 2 }
 0x7b9   :  { %v327_v40 = vadd.f32 %v325_v39, %v1504_v12 }
 0x7bb   :  { %v1267_v41 = vmul.f32 -1.442695, %v327_v40 }
 0x7bd   :  { %1334 = vpow2.f32 %v1267_v41 }
 0x7c3   :  { %v1335_v42 = vpop.eup %1334 }
 0x7c4   :  { %v331_v43 = vadd.f32 1.0, %v1335_v42 }
 0x7c6   :  { %1336 = vrcp.f32 %v331_v43  ;;  %v343_v47 = vand.u32 2147483648, %v331_v43  ;;  %v341_v49 = vand.u32 2147483647, %v331_v43  ;;  %vm337_vm14 = vweird.f32 %v331_v43 }
 0x7c8   :  { %v344_v51 = vor.u32 1.1754944e-38, %v343_v47  ;;  %vm342_vm1 = vcmp.eq.f32.partialorder %v341_v49, 8.507059e+37 }
 0x7cc   :  { %v1337_v44 = vpop.eup %1336 }
 0x7cd   :  { %v333_v45 = vmul.f32 %v1337_v44, %v331_v43  ;;  %vm338_vm13 = vweird.f32 %v1337_v44 }
 0x7ce   :  { %vm339_vm15 = vmor %vm337_vm14, %vm338_vm13 }
 0x7cf   :  { %v334_v46 = vsub.f32 1.0, %v333_v45 }
 0x7d1   :  { %v335_v48 = vmul.f32 %v1337_v44, %v334_v46 }
 0x7d3   :  { %v336_v50 = vadd.f32 %v1337_v44, %v335_v48 }
 0x7d5   :  { %v340_v52 = vsel %vm339_vm15, %v1337_v44, %v336_v50 }
 0x7d6   :  { %v345_v53 = vsel %vm342_vm1, %v344_v51, %v340_v52 }
 0x7d7   :  { %v347_v12 = vmul.f32 2.0, %v345_v53  ;;  %v352_v58 = vmul.f32 %v350_v57, %v345_v53 }
 0x7d9   :  { %v1268_v54 = vadd.f32 -1.0, %v347_v12 }
 0x7db   :  { %354 = vrot.lane.b32.xlu0 %v1268_v54, %s1440_s23 }
 0x84d   :  { %v355_v55 = vpop.permute.xlu0 %354 }
 0x84e   :  { %v357_v56 = vmul.f32 %v355_v55, %v345_v53 }
 0x850   :  { %359 = vrot.lane.b32.xlu1 %v357_v56, %s1441_s24 }
 0x8c2   :  { %v360_v59 = vpop.permute.xlu1 %359 }
 0x8c3   :  { %v362_v60 = vadd.f32 %v360_v59, %v352_v58 }
 0x8c5   :  { %1338 = vtanh.f32 %v362_v60  ;;  %v418_v32 = vrot.slane %v362_v60, 6 }
 0x8cb   :  { %v1339_v61 = vpop.eup %1338 }
 0x8cc   :  { %365 = vrot.lane.b32.xlu2 %v1339_v61, %s1442_s25 }
 0x926   :  { %v366_v0 = vpop.permute.xlu2 %365 }
 0x927   :  { %v368_v1 = vmul.f32 %v366_v0, %v345_v53 }
 0x929   :  { %v370_v2 = vrot.slane %v368_v1, 6 }
 0x92b   :  { %371 = vrot.lane.b32.xlu0 %v370_v2, %s1443_s26 }
 0x99d   :  { %v372_v6 = vpop.permute.xlu0 %371 }
 0x99e   :  { %1269 = vmatmul.msk.f32.vlgmr.msrb.gmra.mxu0 %vm22_vm0, %v372_v6 }
 0x99f   :  { %875 = vmatpush.msrb.mxu0 %v1546_v5 }
 0xa1b   :  { %v392_v14 = vpop.f32.mrf.mxu0 }
 0xa1c   :  { %v395_v15 = vadd.f32 %v392_v14, %v1555_v13 }
 0xa1e   :  { %v1270_v4 = vmul.f32 -1.442695, %v395_v15 }
 0xa20   :  { %1340 = vpow2.f32 %v1270_v4 }
 0xa26   :  { %v1341_v16 = vpop.eup %1340 }
 0xa27   :  { %v399_v17 = vadd.f32 1.0, %v1341_v16 }
 0xa29   :  { %1342 = vrcp.f32 %v399_v17  ;;  %v411_v21 = vand.u32 2147483648, %v399_v17  ;;  %v409_v23 = vand.u32 2147483647, %v399_v17  ;;  %vm405_vm3 = vweird.f32 %v399_v17 }
 0xa2b   :  { %v412_v25 = vor.u32 1.1754944e-38, %v411_v21  ;;  %vm410_vm5 = vcmp.eq.f32.partialorder %v409_v23, 8.507059e+37 }
 0xa2f   :  { %v1343_v18 = vpop.eup %1342 }
 0xa30   :  { %v401_v19 = vmul.f32 %v1343_v18, %v399_v17  ;;  %vm406_vm2 = vweird.f32 %v1343_v18 }
 0xa31   :  { %vm407_vm4 = vmor %vm405_vm3, %vm406_vm2 }
 0xa32   :  { %v402_v20 = vsub.f32 1.0, %v401_v19 }
 0xa34   :  { %v403_v22 = vmul.f32 %v1343_v18, %v402_v20 }
 0xa36   :  { %v404_v24 = vadd.f32 %v1343_v18, %v403_v22 }
 0xa38   :  { %v408_v26 = vsel %vm407_vm4, %v1343_v18, %v404_v24 }
 0xa39   :  { %v413_v27 = vsel %vm410_vm5, %v412_v25, %v408_v26 }
 0xa3a   :  { %v415_v28 = vmul.f32 2.0, %v413_v27  ;;  %v420_v33 = vmul.f32 %v418_v32, %v413_v27 }
 0xa3c   :  { %v1271_v29 = vadd.f32 -1.0, %v415_v28 }
 0xa3e   :  { %422 = vrot.lane.b32.xlu1 %v1271_v29, %s1440_s23 }
 0xab0   :  { %v423_v30 = vpop.permute.xlu1 %422 }
 0xab1   :  { %v425_v31 = vmul.f32 %v423_v30, %v413_v27 }
 0xab3   :  { %427 = vrot.lane.b32.xlu2 %v425_v31, %s1441_s24 }
 0xb0d   :  { %v428_v34 = vpop.permute.xlu2 %427 }
 0xb0e   :  { %v430_v35 = vadd.f32 %v428_v34, %v420_v33 }
 0xb10   :  { %1344 = vtanh.f32 %v430_v35  ;;  %v488_v59 = vrot.slane %v430_v35, 6 }
 0xb16   :  { %v1345_v36 = vpop.eup %1344 }
 0xb17   :  { %433 = vrot.lane.b32.xlu0 %v1345_v36, %s1442_s25 }
 0xb89   :  { %v434_v37 = vpop.permute.xlu0 %433 }
 0xb8a   :  { %v436_v38 = vmul.f32 %v434_v37, %v413_v27 }
 0xb8c   :  { %438 = vrot.lane.b32.xlu1 %v436_v38, %s1443_s26 }
 0xbfe   :  { %v439_v39 = vpop.permute.xlu1 %438 }
 0xbff   :  { %1272 = vmatmul.msk.f32.vlgmr.msrb.gmra.mxu2 %vm22_vm0, %v439_v39 }
 0xc00   :  { %1001 = vmatpush.msrb.mxu2 %v1546_v5 }
 0xc82   :  { %v459_v40 = vpop.f32.mrf.mxu2 }
 0xc83   :  { %v463_v41 = vrot.slane %v459_v40, 6 }
 0xc85   :  { %v465_v42 = vadd.f32 %v463_v41, %v1555_v13 }
 0xc87   :  { %v1273_v43 = vmul.f32 -1.442695, %v465_v42 }
 0xc89   :  { %1346 = vpow2.f32 %v1273_v43 }
 0xc8f   :  { %v1347_v44 = vpop.eup %1346 }
 0xc90   :  { %v469_v45 = vadd.f32 1.0, %v1347_v44 }
 0xc92   :  { %1348 = vrcp.f32 %v469_v45  ;;  %v481_v49 = vand.u32 2147483648, %v469_v45  ;;  %v479_v51 = vand.u32 2147483647, %v469_v45  ;;  %vm475_vm7 = vweird.f32 %v469_v45 }
 0xc94   :  { %v482_v53 = vor.u32 1.1754944e-38, %v481_v49  ;;  %vm480_vm9 = vcmp.eq.f32.partialorder %v479_v51, 8.507059e+37 }
 0xc98   :  { %v1349_v46 = vpop.eup %1348 }
 0xc99   :  { %v471_v47 = vmul.f32 %v1349_v46, %v469_v45  ;;  %vm476_vm6 = vweird.f32 %v1349_v46 }
 0xc9a   :  { %vm477_vm8 = vmor %vm475_vm7, %vm476_vm6 }
 0xc9b   :  { %v472_v48 = vsub.f32 1.0, %v471_v47 }
 0xc9d   :  { %v473_v50 = vmul.f32 %v1349_v46, %v472_v48 }
 0xc9f   :  { %v474_v52 = vadd.f32 %v1349_v46, %v473_v50 }
 0xca1   :  { %v478_v12 = vsel %vm477_vm8, %v1349_v46, %v474_v52 }
 0xca2   :  { %v483_v54 = vsel %vm480_vm9, %v482_v53, %v478_v12 }
 0xca3   :  { %v485_v55 = vmul.f32 2.0, %v483_v54  ;;  %v490_v60 = vmul.f32 %v488_v59, %v483_v54 }
 0xca5   :  { %v1274_v56 = vadd.f32 -1.0, %v485_v55 }
 0xca7   :  { %492 = vrot.lane.b32.xlu2 %v1274_v56, %s1440_s23 }
 0xd01   :  { %v493_v57 = vpop.permute.xlu2 %492 }
 0xd02   :  { %v495_v58 = vmul.f32 %v493_v57, %v483_v54 }
 0xd04   :  { %497 = vrot.lane.b32.xlu0 %v495_v58, %s1441_s24 }
 0xd76   :  { %v498_v61 = vpop.permute.xlu0 %497 }
 0xd77   :  { %v500_v63 = vadd.f32 %v498_v61, %v490_v60 }
 0xd79   :  { %1350 = vtanh.f32 %v500_v63  ;;  %v559_v32 = vrot.slane %v500_v63, 6 }
 0xd7f   :  { %v1351_v0 = vpop.eup %1350 }
 0xd80   :  { %503 = vrot.lane.b32.xlu1 %v1351_v0, %s1442_s25 }
 0xdf2   :  { %v504_v1 = vpop.permute.xlu1 %503 }
 0xdf3   :  { %v506_v2 = vmul.f32 %v504_v1, %v483_v54 }
 0xdf5   :  { %v508_v3 = vrot.slane %v506_v2, 2 }
 0xdf7   :  { %509 = vrot.lane.b32.xlu2 %v508_v3, %s1443_s26 }
 0xe51   :  { %v510_v6 = vpop.permute.xlu2 %509 }
 0xe52   :  { %1275 = vmatmul.msk.f32.vlgmr.msra.gmra.mxu3 %vm22_vm0, %v510_v6  ;;  %v93_v6 = vadd.f32 %v1498_v9, %v1501_v11 }
 0xe53   :  { %1064 = vmatpush.msra.mxu3 %v1546_v5 }
 0xed5   :  { %v530_v10 = vpop.f32.mrf.mxu3 }
 0xed6   :  { %v534_v14 = vrot.slane %v530_v10, 4 }
 0xed8   :  { %v536_v15 = vadd.f32 %v534_v14, %v1555_v13 }
 0xeda   :  { %v1276_v4 = vmul.f32 -1.442695, %v536_v15 }
 0xedc   :  { %1352 = vpow2.f32 %v1276_v4 }
 0xee2   :  { %v1353_v16 = vpop.eup %1352 }
 0xee3   :  { %v540_v17 = vadd.f32 1.0, %v1353_v16 }
 0xee5   :  { %1354 = vrcp.f32 %v540_v17  ;;  %v552_v21 = vand.u32 2147483648, %v540_v17  ;;  %v550_v23 = vand.u32 2147483647, %v540_v17  ;;  %vm546_vm11 = vweird.f32 %v540_v17 }
 0xee7   :  { %v553_v25 = vor.u32 1.1754944e-38, %v552_v21  ;;  %vm551_vm13 = vcmp.eq.f32.partialorder %v550_v23, 8.507059e+37 }
 0xeeb   :  { %v1355_v18 = vpop.eup %1354 }
 0xeec   :  { %v542_v19 = vmul.f32 %v1355_v18, %v540_v17  ;;  %vm547_vm10 = vweird.f32 %v1355_v18 }
 0xeed   :  { %vm548_vm12 = vmor %vm546_vm11, %vm547_vm10 }
 0xeee   :  { %v543_v20 = vsub.f32 1.0, %v542_v19 }
 0xef0   :  { %v544_v22 = vmul.f32 %v1355_v18, %v543_v20 }
 0xef2   :  { %v545_v24 = vadd.f32 %v1355_v18, %v544_v22 }
 0xef4   :  { %v549_v26 = vsel %vm548_vm12, %v1355_v18, %v545_v24 }
 0xef5   :  { %v554_v27 = vsel %vm551_vm13, %v553_v25, %v549_v26 }
 0xef6   :  { %v556_v28 = vmul.f32 2.0, %v554_v27  ;;  %v561_v33 = vmul.f32 %v559_v32, %v554_v27 }
 0xef8   :  { %v1277_v29 = vadd.f32 -1.0, %v556_v28 }
 0xefa   :  { %563 = vrot.lane.b32.xlu0 %v1277_v29, %s1440_s23 }
 0xf6c   :  { %v564_v30 = vpop.permute.xlu0 %563 }
 0xf6d   :  { %v566_v31 = vmul.f32 %v564_v30, %v554_v27 }
 0xf6f   :  { %568 = vrot.lane.b32.xlu1 %v566_v31, %s1441_s24 }
 0xfe1   :  { %v569_v34 = vpop.permute.xlu1 %568 }
 0xfe2   :  { %v571_v35 = vadd.f32 %v569_v34, %v561_v33 }
 0xfe4   :  { %1356 = vtanh.f32 %v571_v35  ;;  %v630_v58 = vrot.slane %v571_v35, 6 }
 0xfea   :  { %v1357_v36 = vpop.eup %1356 }
 0xfeb   :  { %574 = vrot.lane.b32.xlu2 %v1357_v36, %s1442_s25 }
0x1045   :  { %v575_v37 = vpop.permute.xlu2 %574 }
0x1046   :  { %v577_v38 = vmul.f32 %v575_v37, %v554_v27 }
0x1048   :  { %v579_v39 = vrot.slane %v577_v38, 4 }
0x104a   :  { %580 = vrot.lane.b32.xlu0 %v579_v39, %s1443_s26 }
0x10bc   :  { %v581_v40 = vpop.permute.xlu0 %580 }
0x10bd   :  { %1278 = vmatmul.msk.f32.vlgmr.msra.gmra.mxu0 %vm22_vm0, %v581_v40 }
0x10be   :  { %1127 = vmatpush.msra.mxu0 %v1546_v5 }
0x113a   :  { %v601_v41 = vpop.f32.mrf.mxu0 }
0x113b   :  { %v605_v42 = vrot.slane %v601_v41, 2 }
0x113d   :  { %v607_v43 = vadd.f32 %v605_v42, %v1555_v13 }
0x113f   :  { %v1279_v44 = vmul.f32 -1.442695, %v607_v43 }
0x1141   :  { %1358 = vpow2.f32 %v1279_v44 }
0x1147   :  { %v1359_v45 = vpop.eup %1358 }
0x1148   :  { %v611_v46 = vadd.f32 1.0, %v1359_v45 }
0x114a   :  { %1360 = vrcp.f32 %v611_v46  ;;  %v623_v50 = vand.u32 2147483648, %v611_v46  ;;  %v621_v52 = vand.u32 2147483647, %v611_v46  ;;  %vm617_vm15 = vweird.f32 %v611_v46 }
0x114c   :  { %v624_v5 = vor.u32 1.1754944e-38, %v623_v50  ;;  %vm622_vm2 = vcmp.eq.f32.partialorder %v621_v52, 8.507059e+37 }
0x1150   :  { %v1361_v47 = vpop.eup %1360 }
0x1151   :  { %v613_v48 = vmul.f32 %v1361_v47, %v611_v46  ;;  %vm618_vm14 = vweird.f32 %v1361_v47 }
0x1152   :  { %vm619_vm1 = vmor %vm617_vm15, %vm618_vm14 }
0x1153   :  { %v614_v49 = vsub.f32 1.0, %v613_v48 }
0x1155   :  { %v615_v51 = vmul.f32 %v1361_v47, %v614_v49 }
0x1157   :  { %v616_v53 = vadd.f32 %v1361_v47, %v615_v51 }
0x1159   :  { %v620_v12 = vsel %vm619_vm1, %v1361_v47, %v616_v53 }
0x115a   :  { %v625_v54 = vsel %vm622_vm2, %v624_v5, %v620_v12 }
0x115b   :  { %v627_v13 = vmul.f32 2.0, %v625_v54  ;;  %v632_v59 = vmul.f32 %v630_v58, %v625_v54 }
0x115d   :  { %v1280_v55 = vadd.f32 -1.0, %v627_v13 }
0x115f   :  { %634 = vrot.lane.b32.xlu1 %v1280_v55, %s1440_s23 }
0x11d1   :  { %v635_v56 = vpop.permute.xlu1 %634 }
0x11d2   :  { %v637_v57 = vmul.f32 %v635_v56, %v625_v54 }
0x11d4   :  { %639 = vrot.lane.b32.xlu2 %v637_v57, %s1441_s24 }
0x122e   :  { %v640_v60 = vpop.permute.xlu2 %639 }
0x122f   :  { %v642_v61 = vadd.f32 %v640_v60, %v632_v59 }
0x1231   :  { %1362 = vtanh.f32 %v642_v61  ;;  %v698_v28 = vrot.slane %v642_v61, 6 }
0x1237   :  { %v1363_v63 = vpop.eup %1362 }
0x1238   :  { %645 = vrot.lane.b32.xlu0 %v1363_v63, %s1442_s25  ;;  %v53_v63 = vrot.slane %v1496_v8, 1 }
0x12aa   :  { %v646_v0 = vpop.permute.xlu0 %645 }
0x12ab   :  { %v648_v1 = vmul.f32 %v646_v0, %v625_v54  ;;  %v55_v0 = vadd.f32 %v53_v63, %v1552_v7 }
0x12ad   :  { %v650_v2 = vrot.slane %v648_v1, 6  ;;  %v1599_v1 = vperm.slane %v55_v0, 0 }
0x12af   :  { %651 = vrot.lane.b32.xlu1 %v650_v2, %s1443_s26 }
0x1321   :  { %v652_v3 = vpop.permute.xlu1 %651 }
0x1322   :  { %1281 = vmatmul.msk.f32.vlgmr.msrb.gmra.mxu1 %vm22_vm0, %v652_v3 }
0x1323   :  { %1212 = vmatpush.msrb.mxu1 %v1533_v62 }
0x139f   :  { %v672_v10 = vpop.f32.mrf.mxu1 }
0x13a0   :  { %v675_v14 = vadd.f32 %v672_v10, %v93_v6 }
0x13a2   :  { %v1282_v15 = vmul.f32 -1.442695, %v675_v14 }
0x13a4   :  { %1364 = vpow2.f32 %v1282_v15 }
0x13aa   :  { %v1365_v4 = vpop.eup %1364 }
0x13ab   :  { %v679_v16 = vadd.f32 1.0, %v1365_v4 }
0x13ad   :  { %1366 = vrcp.f32 %v679_v16  ;;  %v691_v20 = vand.u32 2147483648, %v679_v16  ;;  %v689_v22 = vand.u32 2147483647, %v679_v16  ;;  %vm685_vm4 = vweird.f32 %v679_v16 }
0x13af   :  { %v692_v62 = vor.u32 1.1754944e-38, %v691_v20  ;;  %vm690_vm6 = vcmp.eq.f32.partialorder %v689_v22, 8.507059e+37 }
0x13b3   :  { %v1367_v17 = vpop.eup %1366 }
0x13b4   :  { %v681_v18 = vmul.f32 %v1367_v17, %v679_v16  ;;  %vm686_vm3 = vweird.f32 %v1367_v17 }
0x13b5   :  { %vm687_vm5 = vmor %vm685_vm4, %vm686_vm3 }
0x13b6   :  { %v682_v19 = vsub.f32 1.0, %v681_v18 }
0x13b8   :  { %v683_v21 = vmul.f32 %v1367_v17, %v682_v19 }
0x13ba   :  { %v684_v23 = vadd.f32 %v1367_v17, %v683_v21 }
0x13bc   :  { %v688_v24 = vsel %vm687_vm5, %v1367_v17, %v684_v23 }
0x13bd   :  { %v693_v9 = vsel %vm690_vm6, %v692_v62, %v688_v24 }
0x13be   :  { %v695_v11 = vmul.f32 2.0, %v693_v9  ;;  %v700_v29 = vmul.f32 %v698_v28, %v693_v9 }
0x13c0   :  { %v1283_v25 = vadd.f32 -1.0, %v695_v11 }
0x13c2   :  { %702 = vrot.lane.b32.xlu2 %v1283_v25, %s1440_s23 }
0x141c   :  { %v703_v26 = vpop.permute.xlu2 %702 }
0x141d   :  { %v705_v27 = vmul.f32 %v703_v26, %v693_v9 }
0x141f   :  { %707 = vrot.lane.b32.xlu0 %v705_v27, %s1441_s24 }
0x1491   :  { %v708_v30 = vpop.permute.xlu0 %707 }
0x1492   :  { %v710_v31 = vadd.f32 %v708_v30, %v700_v29 }
0x1494   :  { %1368 = vtanh.f32 %v710_v31  ;;  %v768_v54 = vrot.slane %v710_v31, 6 }
0x149a   :  { %v1369_v32 = vpop.eup %1368 }
0x149b   :  { %713 = vrot.lane.b32.xlu1 %v1369_v32, %s1442_s25 }
0x150d   :  { %v714_v33 = vpop.permute.xlu1 %713 }
0x150e   :  { %v716_v34 = vmul.f32 %v714_v33, %v693_v9 }
0x1510   :  { %718 = vrot.lane.b32.xlu2 %v716_v34, %s1443_s26 }
0x156a   :  { %v719_v35 = vpop.permute.xlu2 %718 }
0x156b   :  { %1284 = vmatmul.msk.f32.vlgmr.msra.gmra.mxu2 %vm22_vm0, %v719_v35 }
0x15ee   :  { %v739_v36 = vpop.f32.mrf.mxu2 }
0x15ef   :  { %v743_v37 = vrot.slane %v739_v36, 6 }
0x15f1   :  { %v745_v38 = vadd.f32 %v743_v37, %v93_v6 }
0x15f3   :  { %v1285_v39 = vmul.f32 -1.442695, %v745_v38 }
0x15f5   :  { %1370 = vpow2.f32 %v1285_v39 }
0x15fb   :  { %v1371_v40 = vpop.eup %1370 }
0x15fc   :  { %v749_v41 = vadd.f32 1.0, %v1371_v40 }
0x15fe   :  { %1372 = vrcp.f32 %v749_v41  ;;  %v761_v45 = vand.u32 2147483648, %v749_v41  ;;  %v759_v47 = vand.u32 2147483647, %v749_v41  ;;  %vm755_vm8 = vweird.f32 %v749_v41 }
0x1600   :  { %v762_v49 = vor.u32 1.1754944e-38, %v761_v45  ;;  %vm760_vm10 = vcmp.eq.f32.partialorder %v759_v47, 8.507059e+37 }
0x1604   :  { %v1373_v42 = vpop.eup %1372 }
0x1605   :  { %v751_v43 = vmul.f32 %v1373_v42, %v749_v41  ;;  %vm756_vm7 = vweird.f32 %v1373_v42 }
0x1606   :  { %vm757_vm9 = vmor %vm755_vm8, %vm756_vm7  ;;  %vm1179_vm8 = vcmask 1041408  }
0x1607   :  { %v752_v44 = vsub.f32 1.0, %v751_v43 }
0x1609   :  { %v753_v46 = vmul.f32 %v1373_v42, %v752_v44 }
0x160b   :  { %v754_v48 = vadd.f32 %v1373_v42, %v753_v46 }
0x160d   :  { %v758_v50 = vsel %vm757_vm9, %v1373_v42, %v754_v48  ;;  %vm1181_vm9 = vcmask 1043456  }
0x160e   :  { %v763_v51 = vsel %vm760_vm10, %v762_v49, %v758_v50 }
0x160f   :  { %v765_v52 = vmul.f32 2.0, %v763_v51  ;;  %v770_v13 = vmul.f32 %v768_v54, %v763_v51 }
0x1611   :  { %v1286_v53 = vadd.f32 -1.0, %v765_v52 }
0x1613   :  { %772 = vrot.lane.b32.xlu0 %v1286_v53, %s1440_s23 }
0x1685   :  { %v773_v5 = vpop.permute.xlu0 %772 }
0x1686   :  { %v775_v12 = vmul.f32 %v773_v5, %v763_v51 }
0x1688   :  { %777 = vrot.lane.b32.xlu1 %v775_v12, %s1441_s24 }
0x16fa   :  { %v778_v55 = vpop.permute.xlu1 %777 }
0x16fb   :  { %v780_v56 = vadd.f32 %v778_v55, %v770_v13 }
0x16fd   :  { %1374 = vtanh.f32 %v780_v56  ;;  %v836_v9 = vrot.slane %v780_v56, 2 }
0x1703   :  { %v1375_v57 = vpop.eup %1374 }
0x1704   :  { %783 = vrot.lane.b32.xlu2 %v1375_v57, %s1442_s25 }
0x175e   :  { %v784_v58 = vpop.permute.xlu2 %783 }
0x175f   :  { %v786_v59 = vmul.f32 %v784_v58, %v763_v51 }
0x1761   :  { %v789_v60 = vrot.slane %v786_v59, 2 }
0x1763   :  { %790 = vrot.lane.b32.xlu0 %v789_v60, %s1443_s26 }
0x17d5   :  { %v791_v61 = vpop.permute.xlu0 %790 }
0x17d6   :  { %1287 = vmatmul.msk.f32.vlgmr.msrb.gmra.mxu3 %vm22_vm0, %v791_v61 }
0x1859   :  { %v811_v2 = vpop.f32.mrf.mxu3 }
0x185a   :  { %v812_v3 = vadd.f32 %v811_v2, %v1599_v1 }
0x185c   :  { %v1288_v6 = vmul.f32 -1.442695, %v812_v3 }
0x185e   :  { %1376 = vpow2.f32 %v1288_v6 }
0x1864   :  { %v1377_v10 = vpop.eup %1376 }
0x1865   :  { %v817_v14 = vadd.f32 1.0, %v1377_v10 }
0x1867   :  { %1378 = vrcp.f32 %v817_v14  ;;  %v829_v17 = vand.u32 2147483648, %v817_v14  ;;  %v827_v19 = vand.u32 2147483647, %v817_v14  ;;  %vm823_vm12 = vweird.f32 %v817_v14 }
0x1869   :  { %v830_v7 = vor.u32 1.1754944e-38, %v829_v17  ;;  %vm828_vm14 = vcmp.eq.f32.partialorder %v827_v19, 8.507059e+37 }
0x186d   :  { %v1379_v15 = vpop.eup %1378 }
0x186e   :  { %v819_v4 = vmul.f32 %v1379_v15, %v817_v14  ;;  %vm824_vm11 = vweird.f32 %v1379_v15 }
0x186f   :  { %vm825_vm13 = vmor %vm823_vm12, %vm824_vm11 }
0x1870   :  { %v820_v16 = vsub.f32 1.0, %v819_v4 }
0x1872   :  { %v821_v18 = vmul.f32 %v1379_v15, %v820_v16 }
0x1874   :  { %v822_v8 = vadd.f32 %v1379_v15, %v821_v18 }
0x1876   :  { %v826_v20 = vsel %vm825_vm13, %v1379_v15, %v822_v8 }
0x1877   :  { %v831_v21 = vsel %vm828_vm14, %v830_v7, %v826_v20  ;;  %vm1183_vm14 = vcmask 1045504  }
0x1878   :  { %v833_v22 = vmul.f32 2.0, %v831_v21  ;;  %v838_v11 = vmul.f32 %v836_v9, %v831_v21 }
0x187a   :  { %v1289_v23 = vadd.f32 -1.0, %v833_v22 }
0x187c   :  { %840 = vrot.lane.b32.xlu1 %v1289_v23, %s1440_s23 }
0x18ee   :  { %v841_v62 = vpop.permute.xlu1 %840 }
0x18ef   :  { %v843_v24 = vmul.f32 %v841_v62, %v831_v21 }
0x18f1   :  { %845 = vrot.lane.b32.xlu2 %v843_v24, %s1441_s24 }
0x194b   :  { %v846_v25 = vpop.permute.xlu2 %845 }
0x194c   :  { %v848_v26 = vadd.f32 %v846_v25, %v838_v11 }
0x194e   :  { %1380 = vtanh.f32 %v848_v26 }
0x1954   :  { %v1381_v27 = vpop.eup %1380 }
0x1955   :  { %851 = vrot.lane.b32.xlu0 %v1381_v27, %s1442_s25 }
0x19c7   :  { %v852_v28 = vpop.permute.xlu0 %851 }
0x19c8   :  { %v1605_v29 = vmul.f32 %v852_v28, %v831_v21 }
0x19ca   :  { %856 = vrot.lane.b32.xlu1 %v1605_v29, %s1443_s26 }
0x1a3c   :  { %v857_v30 = vpop.permute.xlu1 %856 }
0x1a3d   :  { %1290 = vmatmul.msk.f32.vlgmr.msrb.gmra.mxu0 %vm22_vm0, %v857_v30 }
0x1aba   :  { %v877_v31 = vpop.f32.mrf.mxu0 }
0x1abb   :  { %v878_v32 = vadd.f32 %v877_v31, %v1599_v1 }
0x1abd   :  { %v1291_v33 = vmul.f32 -1.442695, %v878_v32 }
0x1abf   :  { %1382 = vpow2.f32 %v1291_v33 }
0x1ac5   :  { %v1383_v34 = vpop.eup %1382 }
0x1ac6   :  { %v883_v35 = vadd.f32 1.0, %v1383_v34 }
0x1ac8   :  { %1384 = vrcp.f32 %v883_v35  ;;  %v895_v39 = vand.u32 2147483648, %v883_v35  ;;  %v893_v41 = vand.u32 2147483647, %v883_v35  ;;  %vm889_vm1 = vweird.f32 %v883_v35 }
0x1aca   :  { %v896_v43 = vor.u32 1.1754944e-38, %v895_v39  ;;  %vm894_vm3 = vcmp.eq.f32.partialorder %v893_v41, 8.507059e+37 }
0x1ace   :  { %v1385_v36 = vpop.eup %1384 }
0x1acf   :  { %v885_v37 = vmul.f32 %v1385_v36, %v883_v35  ;;  %vm890_vm15 = vweird.f32 %v1385_v36 }
0x1ad0   :  { %vm891_vm2 = vmor %vm889_vm1, %vm890_vm15 }
0x1ad1   :  { %v886_v38 = vsub.f32 1.0, %v885_v37 }
0x1ad3   :  { %v887_v40 = vmul.f32 %v1385_v36, %v886_v38 }
0x1ad5   :  { %v888_v42 = vadd.f32 %v1385_v36, %v887_v40 }
0x1ad7   :  { %v892_v44 = vsel %vm891_vm2, %v1385_v36, %v888_v42 }
0x1ad8   :  { %v897_v45 = vsel %vm894_vm3, %v896_v43, %v892_v44 }
0x1ad9   :  { %v899_v46 = vmul.f32 2.0, %v897_v45  ;;  %v901_v50 = vmul.f32 %v897_v45, %v848_v26 }
0x1adb   :  { %v1292_v47 = vadd.f32 -1.0, %v899_v46 }
0x1add   :  { %903 = vrot.lane.b32.xlu2 %v1292_v47, %s1440_s23 }
0x1b37   :  { %v904_v48 = vpop.permute.xlu2 %903 }
0x1b38   :  { %v906_v49 = vmul.f32 %v904_v48, %v897_v45 }
0x1b3a   :  { %908 = vrot.lane.b32.xlu0 %v906_v49, %s1441_s24 }
0x1bac   :  { %v909_v51 = vpop.permute.xlu0 %908 }
0x1bad   :  { %v911_v52 = vadd.f32 %v909_v51, %v901_v50 }
0x1baf   :  { %1386 = vtanh.f32 %v911_v52 }
0x1bb5   :  { %v1387_v53 = vpop.eup %1386 }
0x1bb6   :  { %914 = vrot.lane.b32.xlu1 %v1387_v53, %s1442_s25 }
0x1c28   :  { %v915_v5 = vpop.permute.xlu1 %914 }
0x1c29   :  { %v917_v12 = vmul.f32 %v915_v5, %v897_v45 }
0x1c2b   :  { %919 = vrot.lane.b32.xlu2 %v917_v12, %s1443_s26  ;;  %v1170_v20 = vrot.slane %v917_v12, 6 }
0x1c2d   :  { %v1180_v62 = vsel %vm1179_vm8, %v1605_v29, %v1170_v20 }
0x1c85   :  { %v920_v54 = vpop.permute.xlu2 %919 }
0x1c86   :  { %1293 = vmatmul.msk.f32.vlgmr.msra.gmra.mxu1 %vm22_vm0, %v920_v54 }
0x1d03   :  { %v940_v13 = vpop.f32.mrf.mxu1 }
0x1d04   :  { %v941_v55 = vadd.f32 %v940_v13, %v1599_v1 }
0x1d06   :  { %v1294_v56 = vmul.f32 -1.442695, %v941_v55 }
0x1d08   :  { %1388 = vpow2.f32 %v1294_v56 }
0x1d0e   :  { %v1389_v57 = vpop.eup %1388 }
0x1d0f   :  { %v946_v58 = vadd.f32 1.0, %v1389_v57 }
0x1d11   :  { %1390 = vrcp.f32 %v946_v58  ;;  %v958_v63 = vand.u32 2147483648, %v946_v58  ;;  %v956_v2 = vand.u32 2147483647, %v946_v58  ;;  %vm952_vm5 = vweird.f32 %v946_v58 }
0x1d13   :  { %v959_v6 = vor.u32 1.1754944e-38, %v958_v63  ;;  %vm957_vm7 = vcmp.eq.f32.partialorder %v956_v2, 8.507059e+37 }
0x1d17   :  { %v1391_v59 = vpop.eup %1390 }
0x1d18   :  { %v948_v60 = vmul.f32 %v1391_v59, %v946_v58  ;;  %vm953_vm4 = vweird.f32 %v1391_v59 }
0x1d19   :  { %vm954_vm6 = vmor %vm952_vm5, %vm953_vm4 }
0x1d1a   :  { %v949_v61 = vsub.f32 1.0, %v948_v60 }
0x1d1c   :  { %v950_v0 = vmul.f32 %v1391_v59, %v949_v61 }
0x1d1e   :  { %v951_v3 = vadd.f32 %v1391_v59, %v950_v0 }
0x1d20   :  { %v955_v10 = vsel %vm954_vm6, %v1391_v59, %v951_v3 }
0x1d21   :  { %v960_v14 = vsel %vm957_vm7, %v959_v6, %v955_v10 }
0x1d22   :  { %v962_v15 = vmul.f32 2.0, %v960_v14  ;;  %v964_v18 = vmul.f32 %v960_v14, %v911_v52 }
0x1d24   :  { %v1295_v4 = vadd.f32 -1.0, %v962_v15 }
0x1d26   :  { %966 = vrot.lane.b32.xlu0 %v1295_v4, %s1440_s23 }
0x1d98   :  { %v967_v16 = vpop.permute.xlu0 %966 }
0x1d99   :  { %v969_v17 = vmul.f32 %v967_v16, %v960_v14 }
0x1d9b   :  { %971 = vrot.lane.b32.xlu1 %v969_v17, %s1441_s24 }
0x1e0d   :  { %v972_v19 = vpop.permute.xlu1 %971 }
0x1e0e   :  { %v974_v8 = vadd.f32 %v972_v19, %v964_v18 }
0x1e10   :  { %1392 = vtanh.f32 %v974_v8 }
0x1e16   :  { %v1393_v7 = vpop.eup %1392 }
0x1e17   :  { %977 = vrot.lane.b32.xlu2 %v1393_v7, %s1442_s25 }
0x1e71   :  { %v978_v21 = vpop.permute.xlu2 %977 }
0x1e72   :  { %v980_v22 = vmul.f32 %v978_v21, %v960_v14 }
0x1e74   :  { %v1172_v23 = vrot.slane %v980_v22, 4  ;;  %982 = vrot.lane.b32.xlu0 %v980_v22, %s1443_s26 }
0x1e76   :  { %v1182_v24 = vsel %vm1181_vm9, %v1180_v62, %v1172_v23  ;;  %vm1226_vm9 = vcmask 62468  }
0x1ee6   :  { %v983_v9 = vpop.permute.xlu0 %982 }
0x1ee7   :  { %1296 = vmatmul.msk.f32.vlgmr.msrb.gmra.mxu2 %vm22_vm0, %v983_v9 }
0x1f6a   :  { %v1003_v11 = vpop.f32.mrf.mxu2 }
0x1f6b   :  { %v1004_v25 = vadd.f32 %v1003_v11, %v1599_v1 }
0x1f6d   :  { %v1297_v26 = vmul.f32 -1.442695, %v1004_v25 }
0x1f6f   :  { %1394 = vpow2.f32 %v1297_v26 }
0x1f75   :  { %v1395_v27 = vpop.eup %1394 }
0x1f76   :  { %v1009_v28 = vadd.f32 1.0, %v1395_v27 }
0x1f78   :  { %1396 = vrcp.f32 %v1009_v28  ;;  %v1021_v33 = vand.u32 2147483648, %v1009_v28  ;;  %v1019_v35 = vand.u32 2147483647, %v1009_v28  ;;  %vm1015_vm11 = vweird.f32 %v1009_v28 }
0x1f7a   :  { %v1022_v36 = vor.u32 1.1754944e-38, %v1021_v33  ;;  %vm1020_vm13 = vcmp.eq.f32.partialorder %v1019_v35, 8.507059e+37 }
0x1f7e   :  { %v1397_v30 = vpop.eup %1396 }
0x1f7f   :  { %v1011_v31 = vmul.f32 %v1397_v30, %v1009_v28  ;;  %vm1016_vm10 = vweird.f32 %v1397_v30 }
0x1f80   :  { %vm1017_vm12 = vmor %vm1015_vm11, %vm1016_vm10  ;;  %vm1229_vm10 = vcmask 64518   ;;  %vm1220_vm11 = vcmask 58368  }
0x1f81   :  { %v1012_v32 = vsub.f32 1.0, %v1011_v31 }
0x1f83   :  { %v1013_v34 = vmul.f32 %v1397_v30, %v1012_v32 }
0x1f85   :  { %v1014_v29 = vadd.f32 %v1397_v30, %v1013_v34 }
0x1f87   :  { %v1018_v37 = vsel %vm1017_vm12, %v1397_v30, %v1014_v29  ;;  %vm1223_vm12 = vcmask 60418  }
0x1f88   :  { %v1023_v38 = vsel %vm1020_vm13, %v1022_v36, %v1018_v37 }
0x1f89   :  { %v1025_v39 = vmul.f32 2.0, %v1023_v38  ;;  %v1027_v43 = vmul.f32 %v1023_v38, %v974_v8 }
0x1f8b   :  { %v1298_v40 = vadd.f32 -1.0, %v1025_v39 }
0x1f8d   :  { %1029 = vrot.lane.b32.xlu1 %v1298_v40, %s1440_s23 }
0x1fff   :  { %v1030_v41 = vpop.permute.xlu1 %1029 }
0x2000   :  { %v1032_v42 = vmul.f32 %v1030_v41, %v1023_v38 }
0x2002   :  { %1034 = vrot.lane.b32.xlu2 %v1032_v42, %s1441_s24 }
0x205c   :  { %v1035_v44 = vpop.permute.xlu2 %1034 }
0x205d   :  { %v1037_v45 = vadd.f32 %v1035_v44, %v1027_v43 }
0x205f   :  { %1398 = vtanh.f32 %v1037_v45 }
0x2065   :  { %v1399_v46 = vpop.eup %1398 }
0x2066   :  { %1040 = vrot.lane.b32.xlu0 %v1399_v46, %s1442_s25 }
0x20d8   :  { %v1041_v47 = vpop.permute.xlu0 %1040 }
0x20d9   :  { %v1043_v48 = vmul.f32 %v1041_v47, %v1023_v38  ;;  %v1412_v38 = vld [vmem:[%s1660_s2 + $0x18] sm:$0x3]  ;;  %s1444_s2 = smov [#allocation2]  }
0x20da   :  { %v1186_v39 = vperm.slane %v1412_v38, 0  ;;  %s1239_s5 = sshll.u32 %s1444_s2, 4  ;;  %s1240_s5 = int_to_ptr.vmem [resolvable:$true] %s1239_s5 }
0x20db   :  { %v1174_v49 = vrot.slane %v1043_v48, 2  ;;  %1045 = vrot.lane.b32.xlu1 %v1043_v48, %s1443_s26 }
0x20dd   :  { %v1629_v50 = vsel %vm1183_vm14, %v1182_v24, %v1174_v49 }
0x214d   :  { %v1046_v51 = vpop.permute.xlu1 %1045 }
0x214e   :  { %1299 = vmatmul.msk.f32.vlgmr.msra.gmra.mxu3 %vm22_vm0, %v1046_v51 }
0x21d1   :  { %v1066_v52 = vpop.f32.mrf.mxu3 }
0x21d2   :  { %v1067_v53 = vadd.f32 %v1066_v52, %v1599_v1 }
0x21d4   :  { %v1300_v5 = vmul.f32 -1.442695, %v1067_v53 }
0x21d6   :  { %1400 = vpow2.f32 %v1300_v5 }
0x21dc   :  { %v1401_v12 = vpop.eup %1400 }
0x21dd   :  { %v1072_v54 = vadd.f32 1.0, %v1401_v12 }
0x21df   :  { %1402 = vrcp.f32 %v1072_v54  ;;  %v1084_v57 = vand.u32 2147483648, %v1072_v54  ;;  %v1082_v59 = vand.u32 2147483647, %v1072_v54  ;;  %vm1078_vm1 = vweird.f32 %v1072_v54 }
0x21e1   :  { %v1085_v61 = vor.u32 1.1754944e-38, %v1084_v57  ;;  %vm1083_vm3 = vcmp.eq.f32.partialorder %v1082_v59, 8.507059e+37 }
0x21e5   :  { %v1403_v13 = vpop.eup %1402 }
0x21e6   :  { %v1074_v55 = vmul.f32 %v1403_v13, %v1072_v54  ;;  %vm1079_vm15 = vweird.f32 %v1403_v13 }
0x21e7   :  { %vm1080_vm2 = vmor %vm1078_vm1, %vm1079_vm15 }
0x21e8   :  { %v1075_v56 = vsub.f32 1.0, %v1074_v55 }
0x21ea   :  { %v1076_v58 = vmul.f32 %v1403_v13, %v1075_v56 }
0x21ec   :  { %v1077_v60 = vadd.f32 %v1403_v13, %v1076_v58 }
0x21ee   :  { %v1081_v63 = vsel %vm1080_vm2, %v1403_v13, %v1077_v60 }
0x21ef   :  { %v1086_v0 = vsel %vm1083_vm3, %v1085_v61, %v1081_v63 }
0x21f0   :  { %v1088_v2 = vmul.f32 2.0, %v1086_v0  ;;  %v1090_v14 = vmul.f32 %v1086_v0, %v1037_v45 }
0x21f2   :  { %v1301_v3 = vadd.f32 -1.0, %v1088_v2 }
0x21f4   :  { %1092 = vrot.lane.b32.xlu2 %v1301_v3, %s1440_s23 }
0x224e   :  { %v1093_v6 = vpop.permute.xlu2 %1092 }
0x224f   :  { %v1095_v10 = vmul.f32 %v1093_v6, %v1086_v0 }
0x2251   :  { %1097 = vrot.lane.b32.xlu0 %v1095_v10, %s1441_s24 }
0x22c3   :  { %v1098_v15 = vpop.permute.xlu0 %1097 }
0x22c4   :  { %v1100_v4 = vadd.f32 %v1098_v15, %v1090_v14 }
0x22c6   :  { %1404 = vtanh.f32 %v1100_v4 }
0x22cc   :  { %v1405_v16 = vpop.eup %1404 }
0x22cd   :  { %1103 = vrot.lane.b32.xlu1 %v1405_v16, %s1442_s25 }
0x233f   :  { %v1104_v17 = vpop.permute.xlu1 %1103 }
0x2340   :  { %v1106_v18 = vmul.f32 %v1104_v17, %v1086_v0 }
0x2342   :  { %1108 = vrot.lane.b32.xlu2 %v1106_v18, %s1443_s26 }
0x239c   :  { %v1109_v19 = vpop.permute.xlu2 %1108 }
0x239d   :  { %1302 = vmatmul.msk.f32.vlgmr.msra.gmra.mxu0 %vm22_vm0, %v1109_v19 }
0x241a   :  { %v1129_v8 = vpop.f32.mrf.mxu0 }
0x241b   :  { %v1130_v7 = vadd.f32 %v1129_v8, %v1599_v1 }
0x241d   :  { %v1303_v20 = vmul.f32 -1.442695, %v1130_v7 }
0x241f   :  { %1406 = vpow2.f32 %v1303_v20 }
0x2425   :  { %v1407_v21 = vpop.eup %1406 }
0x2426   :  { %v1135_v22 = vadd.f32 1.0, %v1407_v21 }
0x2428   :  { %1408 = vrcp.f32 %v1135_v22  ;;  %v1147_v9 = vand.u32 2147483648, %v1135_v22  ;;  %v1145_v25 = vand.u32 2147483647, %v1135_v22  ;;  %vm1141_vm5 = vweird.f32 %v1135_v22 }
0x242a   :  { %v1148_v27 = vor.u32 1.1754944e-38, %v1147_v9  ;;  %vm1146_vm7 = vcmp.eq.f32.partialorder %v1145_v25, 8.507059e+37 }
0x242e   :  { %v1409_v23 = vpop.eup %1408 }
0x242f   :  { %v1137_v62 = vmul.f32 %v1409_v23, %v1135_v22  ;;  %vm1142_vm4 = vweird.f32 %v1409_v23 }
0x2430   :  { %vm1143_vm6 = vmor %vm1141_vm5, %vm1142_vm4 }
0x2431   :  { %v1138_v24 = vsub.f32 1.0, %v1137_v62 }
0x2433   :  { %v1139_v11 = vmul.f32 %v1409_v23, %v1138_v24 }
0x2435   :  { %v1140_v26 = vadd.f32 %v1409_v23, %v1139_v11 }
0x2437   :  { %v1144_v28 = vsel %vm1143_vm6, %v1409_v23, %v1140_v26 }
0x2438   :  { %v1149_v30 = vsel %vm1146_vm7, %v1148_v27, %v1144_v28 }
0x2439   :  { %v1151_v1 = vmul.f32 2.0, %v1149_v30  ;;  %v1153_v35 = vmul.f32 %v1149_v30, %v1100_v4 }
0x243b   :  { %v1304_v31 = vadd.f32 -1.0, %v1151_v1 }
0x243d   :  { %1155 = vrot.lane.b32.xlu0 %v1304_v31, %s1440_s23 }
0x2445   :  { %1189 = vrot.lane.b32.xlu0 %v1629_v50, %s1443_s26 }
0x24af   :  { %v1156_v32 = vpop.permute.xlu0 %1155 }
0x24b0   :  { %v1158_v33 = vmul.f32 %v1156_v32, %v1149_v30 }
0x24b2   :  { %1160 = vrot.lane.b32.xlu1 %v1158_v33, %s1441_s24 }
0x24b7   :  { %v1190_v34 = vpop.permute.xlu0 %1189 }
0x24b8   :  { %1305 = vmatmul.msk.f32.vlgmr.msrb.gmra.mxu1 %vm22_vm0, %v1190_v34 }
0x2524   :  { %v1161_v29 = vpop.permute.xlu1 %1160 }
0x2525   :  { %v1163_v36 = vadd.f32 %v1161_v29, %v1153_v35 }
0x2527   :  { %1410 = vtanh.f32 %v1163_v36 }
0x252d   :  { %v1411_v37 = vpop.eup %1410 }
0x252e   :  { %1166 = vrot.lane.b32.xlu2 %v1411_v37, %s1442_s25 }
0x2535   :  { %v1214_v40 = vpop.f32.mrf.mxu1 }
0x2536   :  { %v1215_v41 = vadd.f32 %v1214_v40, %v1186_v39 }
0x2538   :  { %1227 = vst.msk [vmem:[#allocation2] sm:$0x30] %vm1226_vm9, %v1215_v41 }
0x2539   :  { %1230 = vst.msk [vmem:[#allocation2] sm:$0xc0] %vm1229_vm10, %v1215_v41 }
0x253a   :  { %1221 = vst.msk [vmem:[#allocation2] sm:$0x3] %vm1220_vm11, %v1215_v41 }
0x253b   :  { %1224 = vst.msk [vmem:[#allocation2] sm:$0xc] %vm1223_vm12, %v1215_v41 }
0x2588   :  { %v1167_v42 = vpop.permute.xlu2 %1166 }
0x2589   :  { %v1169_v43 = vmul.f32 %v1167_v42, %v1149_v30 }
0x258b   :  { %v1177_v44 = vrot.slane %v1169_v43, 6 }
0x258d   :  { %v1185_v45 = vsel %vm1179_vm8, %v1106_v18, %v1177_v44 }
0x258e   :  { %1191 = vrot.lane.b32.xlu1 %v1185_v45, %s1443_s26 }
0x2600   :  { %v1192_v46 = vpop.permute.xlu1 %1191 }
0x2601   :  { %1306 = vmatmul.msk.f32.gmra.mxu1 %vm22_vm0, %v1192_v46 }
0x267e   :  { %v1217_v47 = vpop.f32.mrf.mxu1 }
0x267f   :  { %v1218_v48 = vadd.f32 %v1217_v47, %v1186_v39 }
0x2681   :  { %1232 = vst.msk [vmem:[#allocation2 + $0x8] sm:$0x3] %vm1220_vm11, %v1218_v48 }
0x2682   :  { %1234 = vst.msk [vmem:[#allocation2 + $0x8] sm:$0xc] %vm1223_vm12, %v1218_v48 }
0x2683   :  { %1247 = dma.vmem_to_hbm [thread:$0]  %s1240_s5, 192, %s1242_s8, [#allocation3], %s1445_s9, %s1445_s9, %s1446_s10  }
0x2684   :  { %1437 = dma.done.wait [#allocation3], 192  }
0x2685   :  { %1438 = vsyncadd [#allocation3], 4294967104 }
0x2686   :  { %1252 = vsyncpa [#allocation3], 1 }

</bundles_post_ra>
